<compile_context>
chip_gen: v6e
topology: v6e:2x2x1
jax: 0.10.0
libtpu: 0.0.40
codegen_flags: <defaults>
</compile_context>

<pallas_src>
import jax
import jax.numpy as jnp
from jax.experimental import pallas as pl
from jax.experimental.pallas import tpu as pltpu

NUM_LOOPS = 2


def _round_up(x, m):
    return (x + m - 1) // m * m


# --- generation-aware tiling / VMEM budget (conservative fallback = v7x) ----
try:
    _VMEM_CAP = int(pltpu.get_tpu_info().vmem_capacity_bytes)
except Exception:  # query unavailable -> assume the smallest (v7x per-TC) VMEM
    _VMEM_CAP = 64 * 1024 * 1024

_BIG_VMEM = _VMEM_CAP >= 100 * 1024 * 1024
_PREF_TILE_N = 512 if _BIG_VMEM else 256              # 512 on v5e/v6e, 256 on v7x
_VMEM_LIMIT = (64 if _BIG_VMEM else 32) * 1024 * 1024  # scoped limit, shape-safe


def _pick_tile_n(n_pad128, f, fp, g):
    """Largest MXU-aligned row tile whose per-step working set fits the budget."""
    tile = min(_PREF_TILE_N, n_pad128)
    budget = int(_VMEM_LIMIT * 0.8)

    def est(t):
        npad = _round_up(n_pad128, t)
        return (2 * t * npad               # int8 adjacency strips (double buffered)
                + 2 * npad * f * 2         # resident prev features (bf16)
                + 4 * f * max(f, fp) * 2   # H / W weights (bf16)
                + 4 * t * fp * 4           # softmax intermediates (f32)
                + 4 * g * fp * 4           # fingerprint in / accumulator (f32)
                + 4 * t * f * 4)           # v / u tiles (f32)

    while tile > 128 and est(tile) > budget:
        tile //= 2
    return tile


def _sigmoid(z):
    # single EUP tanh instead of exp (EUP) + add (VALU) + full-precision divide
    return 0.5 * (jnp.tanh(0.5 * z) + 1.0)


def _recip(x):
    # EUP approximate reciprocal + one Newton refinement (~f32 accuracy)
    r = pl.reciprocal(x, approx=True)
    return r * (2.0 - x * r)


def neural_loop_kernel(a_ref, out_ref, hw_ref, hb_ref, ww_ref, wb_ref,
                       bmat_ref, fp_in_ref, u_ref, fp_ref):
    # a_ref     : (TILE_N, N_pad) int8   adjacency row strip (with self loops)
    # out_ref   : (N_pad, F)      bf16   previous-layer atom features (resident)
    # hw/hb/ww/wb: layer weights (bf16) / biases (f32), pre-transposed (in, out)
    # bmat_ref  : (G, TILE_N)     bf16   one-hot graph membership for this strip
    # fp_in_ref : (G, FP)         f32    fingerprint accumulated by previous layers
    # u_ref     : (TILE_N, F)     bf16   updated atom features for this row strip
    # fp_ref    : (G, FP)         f32    fingerprint accumulator (resident over grid)
    @pl.when(pl.program_id(0) == 0)
    def _():
        fp_ref[...] = fp_in_ref[...]

    # aggregation: native bf16 MXU path, f32 accumulation (int8 degrees -> exact bf16)
    a = a_ref[...].astype(jnp.bfloat16)
    v = jnp.dot(a, out_ref[...], preferred_element_type=jnp.float32)

    z = jnp.dot(v.astype(jnp.bfloat16), hw_ref[...],
                preferred_element_type=jnp.float32) + hb_ref[...]
    u = _sigmoid(z)
    u_b = u.astype(jnp.bfloat16)

    logits = jnp.dot(u_b, ww_ref[...],
                     preferred_element_type=jnp.float32) + wb_ref[...]
    m = jnp.max(logits, axis=-1, keepdims=True)
    e = jnp.exp(logits - m)
    p = e * _recip(jnp.sum(e, axis=-1, keepdims=True))

    u_ref[...] = u_b
    # fused scatter_add: fingerprint[g] += sum_n B[g, n] * p[n, :]
    fp_ref[...] += jnp.dot(bmat_ref[...], p.astype(jnp.bfloat16),
                           preferred_element_type=jnp.float32)


def _neural_loop(adj_i8, out_prev, hw, hb, ww, wb, bmat, fp_in, tile_n):
    n_pad, f = out_prev.shape
    fp = ww.shape[-1]
    g = bmat.shape[0]
    grid = (n_pad // tile_n,)
    return pl.pallas_call(
        neural_loop_kernel,
        out_shape=(jax.ShapeDtypeStruct((n_pad, f), jnp.bfloat16),
                   jax.ShapeDtypeStruct((g, fp), jnp.float32)),
        grid_spec=pltpu.PrefetchScalarGridSpec(
            num_scalar_prefetch=0,
            grid=grid,
            in_specs=[
                pl.BlockSpec((tile_n, n_pad), lambda i: (i, 0)),  # A strip (streamed)
                pl.BlockSpec((n_pad, f), lambda i: (0, 0)),       # prev features (resident)
                pl.BlockSpec((f, f), lambda i: (0, 0)),           # H weight (in, out)
                pl.BlockSpec((1, f), lambda i: (0, 0)),           # H bias
                pl.BlockSpec((f, fp), lambda i: (0, 0)),          # W weight (in, out)
                pl.BlockSpec((1, fp), lambda i: (0, 0)),          # W bias
                pl.BlockSpec((g, tile_n), lambda i: (0, i)),      # one-hot cols (streamed)
                pl.BlockSpec((g, fp), lambda i: (0, 0)),          # fingerprint carried in
            ],
            out_specs=(pl.BlockSpec((tile_n, f), lambda i: (i, 0)),
                       pl.BlockSpec((g, fp), lambda i: (0, 0))),
        ),
        compiler_params=pltpu.CompilerParams(
            # resident fingerprint accumulator => sequential (reduction) grid axis
            dimension_semantics=("arbitrary",),
            vmem_limit_bytes=_VMEM_LIMIT),
    )(adj_i8, out_prev, hw, hb, ww, wb, bmat, fp_in)


def neural_fp(adj, x, hw, hb, ww, wb, bmat):
    n, f = x.shape
    fp = ww.shape[-1]
    g = bmat.shape[0]
    assert fp % 128 == 0, "fp_size must be a multiple of 128"

    n_pad128 = _round_up(n, 128)
    tile_n = _pick_tile_n(n_pad128, f, fp, g)
    n_pad = _round_up(n, tile_n)

    # Pad node dim to an MXU-aligned multiple of tile_n.  Padded nodes have
    # zero adjacency rows/cols and zero one-hot columns -> never contribute.
    adj_p = jnp.pad(adj, ((0, n_pad - n), (0, n_pad - n)))
    x_p = jnp.pad(x, ((0, n_pad - n), (0, 0)))
    bmat_p = jnp.pad(bmat, ((0, 0), (0, n_pad - n)))

    # Degree counts are tiny exact integers -> int8 storage (1/4 of the f32
    # HBM traffic on the dominant O(N^2) stream); one-hots are exact in bf16.
    adj_i8 = adj_p.astype(jnp.int8)
    bmat_b = bmat_p.astype(jnp.bfloat16)

    out = x_p.astype(jnp.bfloat16)
    fingerprint = jnp.zeros((g, fp), jnp.float32)
    for l in range(NUM_LOOPS):   # two NeuralLoop layers with distinct weights
        out, fingerprint = _neural_loop(
            adj_i8, out,
            hw[l].astype(jnp.bfloat16), hb[l],
            ww[l].astype(jnp.bfloat16), wb[l],
            bmat_b, fingerprint, tile_n)
    return fingerprint


def reference(adj, x, hw, hb, ww, wb, bmat):
    out = x
    fingerprint = jnp.zeros((x.shape[0], ww.shape[-1]), jnp.float32)
    for l in range(NUM_LOOPS):
        v = adj @ out
        u = jax.nn.sigmoid(v @ hw[l] + hb[l])
        p = jax.nn.softmax(u @ ww[l] + wb[l], axis=-1)
        fingerprint = fingerprint + p
        out = u
    return bmat @ fingerprint


if __name__ == "__main__":
    # Small shapes consistent with the module (atom_features, fp_size scaled down).
    N = 8            # number of nodes (batch of 2 graphs, 4 nodes each)
    F = 32           # atom_features
    FP = 256         # fp_size
    G = 2            # number of graphs

    key = jax.random.PRNGKey(0)
    k_x, k_hw, k_hb, k_ww, k_wb = jax.random.split(key, 5)

    x = jax.random.normal(k_x, (N, F), jnp.float32)

    # edge_index: undirected ring within each 4-node graph -> 16 directed edges
    src = jnp.array([0, 1, 1, 2, 2, 3, 3, 0, 4, 5, 5, 6, 6, 7, 7, 4], jnp.int32)
    dst = jnp.array([1, 0, 2, 1, 3, 2, 0, 3, 5, 4, 6, 5, 7, 6, 4, 7], jnp.int32)
    batch = jnp.array([0, 0, 0, 0, 1, 1, 1, 1], jnp.int32)

    # Dense adjacency with self loops: A[dst, src] += 1 ; + I  (PyG flow source_to_target)
    adj = jnp.zeros((N, N), jnp.float32).at[dst, src].add(1.0) + jnp.eye(N, dtype=jnp.float32)

    # One-hot batch scatter matrix [G, N]
    bmat = (batch[None, :] == jnp.arange(G, dtype=jnp.int32)[:, None]).astype(jnp.float32)

    # Deterministic parameters for the two NeuralLoop layers (nn.Linear: y = x @ W^T + b;
    # weights stored pre-transposed as (in, out)).
    scale_h = 1.0 / jnp.sqrt(jnp.float32(F))
    hw = jax.random.uniform(k_hw, (NUM_LOOPS, F, F), jnp.float32, -scale_h, scale_h)
    hb = jax.random.uniform(k_hb, (NUM_LOOPS, 1, F), jnp.float32, -scale_h, scale_h)
    ww = jax.random.uniform(k_ww, (NUM_LOOPS, F, FP), jnp.float32, -scale_h, scale_h)
    wb = jax.random.uniform(k_wb, (NUM_LOOPS, 1, FP), jnp.float32, -scale_h, scale_h)

    fp_fn = jax.jit(neural_fp)
    out = fp_fn(adj, x, hw, hb, ww, wb, bmat)
    out = jax.block_until_ready(out)

    ref = reference(adj, x, hw, hb, ww, wb, bmat)
    assert out.shape == (G, FP)
    # bf16 MXU inputs with f32 accumulation -> ~1e-3-level deviations vs the
    # full-f32 reference (adjacency / one-hot operands remain exact).
    assert jnp.allclose(out, ref, atol=5e-3, rtol=5e-2), "mismatch vs JAX reference"

    print("KERNEL_OK")
</pallas_src>

<mosaic_0001>
module attributes {stable_mosaic.version = 11 : i64} {
  func.func @neural_loop_kernel(%arg0: i32, %arg1: memref<128x128xi8, #tpu.memory_space<vmem>>, %arg2: memref<128x32xbf16, #tpu.memory_space<vmem>>, %arg3: memref<32x32xbf16, #tpu.memory_space<vmem>>, %arg4: memref<1x32xf32, #tpu.memory_space<vmem>>, %arg5: memref<32x256xbf16, #tpu.memory_space<vmem>>, %arg6: memref<1x256xf32, #tpu.memory_space<vmem>>, %arg7: memref<2x128xbf16, #tpu.memory_space<vmem>>, %arg8: memref<2x256xf32, #tpu.memory_space<vmem>>, %arg9: memref<128x32xbf16, #tpu.memory_space<vmem>>, %arg10: memref<2x256xf32, #tpu.memory_space<vmem>>) attributes {dimension_semantics = [#tpu.dimension_semantics<arbitrary>], iteration_bounds = array<i64: 1>, scalar_prefetch = 0 : i64, scratch_operands = 0 : i64, tpu.core_type = #tpu.core_type<tc>, window_params = [{transform_indices = @transform_0, window_bounds = array<i64: 128, 128>}, {pipeline_mode = #tpu.pipeline_mode<synchronous>, transform_indices = @transform_1, window_bounds = array<i64: 128, 32>}, {pipeline_mode = #tpu.pipeline_mode<synchronous>, transform_indices = @transform_2, window_bounds = array<i64: 32, 32>}, {pipeline_mode = #tpu.pipeline_mode<synchronous>, transform_indices = @transform_3, window_bounds = array<i64: 1, 32>}, {pipeline_mode = #tpu.pipeline_mode<synchronous>, transform_indices = @transform_4, window_bounds = array<i64: 32, 256>}, {pipeline_mode = #tpu.pipeline_mode<synchronous>, transform_indices = @transform_5, window_bounds = array<i64: 1, 256>}, {transform_indices = @transform_6, window_bounds = array<i64: 2, 128>}, {pipeline_mode = #tpu.pipeline_mode<synchronous>, transform_indices = @transform_7, window_bounds = array<i64: 2, 256>}, {transform_indices = @transform_8, window_bounds = array<i64: 128, 32>}, {pipeline_mode = #tpu.pipeline_mode<synchronous>, transform_indices = @transform_9, window_bounds = array<i64: 2, 256>}]} {
    %c0_i32 = arith.constant 0 : i32
    %0 = arith.cmpi eq, %arg0, %c0_i32 : i32
    %1 = arith.extui %0 : i1 to i32
    %c0_i32_0 = arith.constant 0 : i32
    %2 = arith.cmpi ne, %1, %c0_i32_0 : i32
    scf.if %2 {
      %c0_29 = arith.constant 0 : index
      %c0_30 = arith.constant 0 : index
      %47 = vector.load %arg8[%c0_29, %c0_30] : memref<2x256xf32, #tpu.memory_space<vmem>>, vector<2x256xf32>
      %c0_31 = arith.constant 0 : index
      %c0_32 = arith.constant 0 : index
      %48 = vector.load %arg10[%c0_31, %c0_32] : memref<2x256xf32, #tpu.memory_space<vmem>>, vector<2x256xf32>
      tpu.vector_store %arg10[%c0_31, %c0_32], %47 {strides = array<i32>} : memref<2x256xf32, #tpu.memory_space<vmem>>, vector<2x256xf32>,
    } else {
    }
    %c0 = arith.constant 0 : index
    %c0_1 = arith.constant 0 : index
    %3 = vector.load %arg1[%c0, %c0_1] : memref<128x128xi8, #tpu.memory_space<vmem>>, vector<128x128xi8>
    %4 = arith.sitofp %3 : vector<128x128xi8> to vector<128x128xbf16>
    %c0_2 = arith.constant 0 : index
    %c0_3 = arith.constant 0 : index
    %5 = vector.load %arg2[%c0_2, %c0_3] : memref<128x32xbf16, #tpu.memory_space<vmem>>, vector<128x32xbf16>
    %cst = arith.constant dense<0.000000e+00> : vector<128x32xf32>
    %6 = tpu.matmul %4, %5, %cst {dimension_numbers = #tpu.dot_dimension_numbers<[1], [0], [0], [1], [0, 0, 1, 1], [], []>} : vector<128x128xbf16>, vector<128x32xbf16>, vector<128x32xf32> -> vector<128x32xf32>
    %7 = arith.truncf %6 : vector<128x32xf32> to vector<128x32xbf16>
    %c0_4 = arith.constant 0 : index
    %c0_5 = arith.constant 0 : index
    %8 = vector.load %arg3[%c0_4, %c0_5] : memref<32x32xbf16, #tpu.memory_space<vmem>>, vector<32x32xbf16>
    %cst_6 = arith.constant dense<0.000000e+00> : vector<128x32xf32>
    %9 = tpu.matmul %7, %8, %cst_6 {dimension_numbers = #tpu.dot_dimension_numbers<[1], [0], [0], [1], [0, 0, 1, 1], [], []>} : vector<128x32xbf16>, vector<32x32xbf16>, vector<128x32xf32> -> vector<128x32xf32>
    %c0_7 = arith.constant 0 : index
    %c0_8 = arith.constant 0 : index
    %10 = vector.load %arg4[%c0_7, %c0_8] : memref<1x32xf32, #tpu.memory_space<vmem>>, vector<1x32xf32>
    %11 = vector.broadcast %10 : vector<1x32xf32> to vector<128x32xf32>
    %12 = arith.addf %9, %11 : vector<128x32xf32>
    %cst_9 = arith.constant 5.000000e-01 : f32
    %13 = vector.broadcast %cst_9 : f32 to vector<128x32xf32>
    %14 = arith.mulf %13, %12 : vector<128x32xf32>
    %15 = math.tanh %14 : vector<128x32xf32>
    %cst_10 = arith.constant 1.000000e+00 : f32
    %16 = vector.broadcast %cst_10 : f32 to vector<128x32xf32>
    %17 = arith.addf %15, %16 : vector<128x32xf32>
    %cst_11 = arith.constant 5.000000e-01 : f32
    %18 = vector.broadcast %cst_11 : f32 to vector<128x32xf32>
    %19 = arith.mulf %18, %17 : vector<128x32xf32>
    %20 = arith.truncf %19 : vector<128x32xf32> to vector<128x32xbf16>
    %c0_12 = arith.constant 0 : index
    %c0_13 = arith.constant 0 : index
    %21 = vector.load %arg5[%c0_12, %c0_13] : memref<32x256xbf16, #tpu.memory_space<vmem>>, vector<32x256xbf16>
    %cst_14 = arith.constant dense<0.000000e+00> : vector<128x256xf32>
    %22 = tpu.matmul %20, %21, %cst_14 {dimension_numbers = #tpu.dot_dimension_numbers<[1], [0], [0], [1], [0, 0, 1, 1], [], []>} : vector<128x32xbf16>, vector<32x256xbf16>, vector<128x256xf32> -> vector<128x256xf32>
    %c0_15 = arith.constant 0 : index
    %c0_16 = arith.constant 0 : index
    %23 = vector.load %arg6[%c0_15, %c0_16] : memref<1x256xf32, #tpu.memory_space<vmem>>, vector<1x256xf32>
    %24 = vector.broadcast %23 : vector<1x256xf32> to vector<128x256xf32>
    %25 = arith.addf %22, %24 : vector<128x256xf32>
    %cst_17 = arith.constant dense<0xFF800000> : vector<128xf32>
    %26 = vector.multi_reduction <maximumf>, %25, %cst_17 [1] : vector<128x256xf32> to vector<128xf32>
    %27 = vector.shape_cast %26 : vector<128xf32> to vector<128x1xf32>
    %28 = vector.broadcast %27 : vector<128x1xf32> to vector<128x256xf32>
    %29 = arith.subf %25, %28 : vector<128x256xf32>
    %30 = math.exp %29 : vector<128x256xf32>
    %cst_18 = arith.constant dense<0.000000e+00> : vector<128xf32>
    %31 = vector.multi_reduction <add>, %30, %cst_18 [1] : vector<128x256xf32> to vector<128xf32>
    %32 = vector.shape_cast %31 : vector<128xf32> to vector<128x1xf32>
    %33 = tpu.reciprocal %32 {approx = true} : vector<128x1xf32> -> vector<128x1xf32>
    %34 = arith.mulf %32, %33 : vector<128x1xf32>
    %cst_19 = arith.constant 2.000000e+00 : f32
    %35 = vector.broadcast %cst_19 : f32 to vector<128x1xf32>
    %36 = arith.subf %35, %34 : vector<128x1xf32>
    %37 = arith.mulf %33, %36 : vector<128x1xf32>
    %38 = vector.broadcast %37 : vector<128x1xf32> to vector<128x256xf32>
    %39 = arith.mulf %30, %38 : vector<128x256xf32>
    %c0_20 = arith.constant 0 : index
    %c0_21 = arith.constant 0 : index
    %40 = vector.load %arg9[%c0_20, %c0_21] : memref<128x32xbf16, #tpu.memory_space<vmem>>, vector<128x32xbf16>
    tpu.vector_store %arg9[%c0_20, %c0_21], %20 {strides = array<i32>} : memref<128x32xbf16, #tpu.memory_space<vmem>>, vector<128x32xbf16>,
    %c0_22 = arith.constant 0 : index
    %c0_23 = arith.constant 0 : index
    %41 = vector.load %arg10[%c0_22, %c0_23] : memref<2x256xf32, #tpu.memory_space<vmem>>, vector<2x256xf32>
    %c0_24 = arith.constant 0 : index
    %c0_25 = arith.constant 0 : index
    %42 = vector.load %arg7[%c0_24, %c0_25] : memref<2x128xbf16, #tpu.memory_space<vmem>>, vector<2x128xbf16>
    %43 = arith.truncf %39 : vector<128x256xf32> to vector<128x256xbf16>
    %cst_26 = arith.constant dense<0.000000e+00> : vector<2x256xf32>
    %44 = tpu.matmul %42, %43, %cst_26 {dimension_numbers = #tpu.dot_dimension_numbers<[1], [0], [0], [1], [0, 0, 1, 1], [], []>} : vector<2x128xbf16>, vector<128x256xbf16>, vector<2x256xf32> -> vector<2x256xf32>
    %45 = arith.addf %41, %44 : vector<2x256xf32>
    %c0_27 = arith.constant 0 : index
    %c0_28 = arith.constant 0 : index
    %46 = vector.load %arg10[%c0_27, %c0_28] : memref<2x256xf32, #tpu.memory_space<vmem>>, vector<2x256xf32>
    tpu.vector_store %arg10[%c0_27, %c0_28], %45 {strides = array<i32>} : memref<2x256xf32, #tpu.memory_space<vmem>>, vector<2x256xf32>,
    return
  }
  func.func @transform_0(%arg0: i32) -> (i32, i32) {
    %c0_i32 = arith.constant 0 : i32
    %c0_i32_0 = arith.constant 0 : i32
    return %arg0, %c0_i32 : i32, i32
  }
  func.func @transform_1(%arg0: i32) -> (i32, i32) {
    %c0_i32 = arith.constant 0 : i32
    %c0_i32_0 = arith.constant 0 : i32
    %c0_i32_1 = arith.constant 0 : i32
    return %c0_i32, %c0_i32_0 : i32, i32
  }
  func.func @transform_2(%arg0: i32) -> (i32, i32) {
    %c0_i32 = arith.constant 0 : i32
    %c0_i32_0 = arith.constant 0 : i32
    %c0_i32_1 = arith.constant 0 : i32
    return %c0_i32, %c0_i32_0 : i32, i32
  }
  func.func @transform_3(%arg0: i32) -> (i32, i32) {
    %c0_i32 = arith.constant 0 : i32
    %c0_i32_0 = arith.constant 0 : i32
    %c0_i32_1 = arith.constant 0 : i32
    return %c0_i32, %c0_i32_0 : i32, i32
  }
  func.func @transform_4(%arg0: i32) -> (i32, i32) {
    %c0_i32 = arith.constant 0 : i32
    %c0_i32_0 = arith.constant 0 : i32
    %c0_i32_1 = arith.constant 0 : i32
    return %c0_i32, %c0_i32_0 : i32, i32
  }
  func.func @transform_5(%arg0: i32) -> (i32, i32) {
    %c0_i32 = arith.constant 0 : i32
    %c0_i32_0 = arith.constant 0 : i32
    %c0_i32_1 = arith.constant 0 : i32
    return %c0_i32, %c0_i32_0 : i32, i32
  }
  func.func @transform_6(%arg0: i32) -> (i32, i32) {
    %c0_i32 = arith.constant 0 : i32
    %c0_i32_0 = arith.constant 0 : i32
    return %c0_i32, %arg0 : i32, i32
  }
  func.func @transform_7(%arg0: i32) -> (i32, i32) {
    %c0_i32 = arith.constant 0 : i32
    %c0_i32_0 = arith.constant 0 : i32
    %c0_i32_1 = arith.constant 0 : i32
    return %c0_i32, %c0_i32_0 : i32, i32
  }
  func.func @transform_8(%arg0: i32) -> (i32, i32) {
    %c0_i32 = arith.constant 0 : i32
    %c0_i32_0 = arith.constant 0 : i32
    return %arg0, %c0_i32 : i32, i32
  }
  func.func @transform_9(%arg0: i32) -> (i32, i32) {
    %c0_i32 = arith.constant 0 : i32
    %c0_i32_0 = arith.constant 0 : i32
    %c0_i32_1 = arith.constant 0 : i32
    return %c0_i32, %c0_i32_0 : i32, i32
  }
}

module attributes {stable_mosaic.version = 11 : i64} {
  func.func @neural_loop_kernel(%arg0: i32, %arg1: memref<128x128xi8, #tpu.memory_space<vmem>>, %arg2: memref<128x32xbf16, #tpu.memory_space<vmem>>, %arg3: memref<32x32xbf16, #tpu.memory_space<vmem>>, %arg4: memref<1x32xf32, #tpu.memory_space<vmem>>, %arg5: memref<32x256xbf16, #tpu.memory_space<vmem>>, %arg6: memref<1x256xf32, #tpu.memory_space<vmem>>, %arg7: memref<2x128xbf16, #tpu.memory_space<vmem>>, %arg8: memref<2x256xf32, #tpu.memory_space<vmem>>, %arg9: memref<128x32xbf16, #tpu.memory_space<vmem>>, %arg10: memref<2x256xf32, #tpu.memory_space<vmem>>) attributes {dimension_semantics = [#tpu.dimension_semantics<arbitrary>], iteration_bounds = array<i64: 1>, scalar_prefetch = 0 : i64, scratch_operands = 0 : i64, tpu.core_type = #tpu.core_type<tc>, window_params = [{transform_indices = @transform_0, window_bounds = array<i64: 128, 128>}, {pipeline_mode = #tpu.pipeline_mode<synchronous>, transform_indices = @transform_1, window_bounds = array<i64: 128, 32>}, {pipeline_mode = #tpu.pipeline_mode<synchronous>, transform_indices = @transform_2, window_bounds = array<i64: 32, 32>}, {pipeline_mode = #tpu.pipeline_mode<synchronous>, transform_indices = @transform_3, window_bounds = array<i64: 1, 32>}, {pipeline_mode = #tpu.pipeline_mode<synchronous>, transform_indices = @transform_4, window_bounds = array<i64: 32, 256>}, {pipeline_mode = #tpu.pipeline_mode<synchronous>, transform_indices = @transform_5, window_bounds = array<i64: 1, 256>}, {transform_indices = @transform_6, window_bounds = array<i64: 2, 128>}, {pipeline_mode = #tpu.pipeline_mode<synchronous>, transform_indices = @transform_7, window_bounds = array<i64: 2, 256>}, {transform_indices = @transform_8, window_bounds = array<i64: 128, 32>}, {pipeline_mode = #tpu.pipeline_mode<synchronous>, transform_indices = @transform_9, window_bounds = array<i64: 2, 256>}]} {
    %c0_i32 = arith.constant 0 : i32
    %0 = arith.cmpi eq, %arg0, %c0_i32 : i32
    %1 = arith.extui %0 : i1 to i32
    %c0_i32_0 = arith.constant 0 : i32
    %2 = arith.cmpi ne, %1, %c0_i32_0 : i32
    scf.if %2 {
      %c0_29 = arith.constant 0 : index
      %c0_30 = arith.constant 0 : index
      %47 = vector.load %arg8[%c0_29, %c0_30] : memref<2x256xf32, #tpu.memory_space<vmem>>, vector<2x256xf32>
      %c0_31 = arith.constant 0 : index
      %c0_32 = arith.constant 0 : index
      %48 = vector.load %arg10[%c0_31, %c0_32] : memref<2x256xf32, #tpu.memory_space<vmem>>, vector<2x256xf32>
      tpu.vector_store %arg10[%c0_31, %c0_32], %47 {strides = array<i32>} : memref<2x256xf32, #tpu.memory_space<vmem>>, vector<2x256xf32>,
    } else {
    }
    %c0 = arith.constant 0 : index
    %c0_1 = arith.constant 0 : index
    %3 = vector.load %arg1[%c0, %c0_1] : memref<128x128xi8, #tpu.memory_space<vmem>>, vector<128x128xi8>
    %4 = arith.sitofp %3 : vector<128x128xi8> to vector<128x128xbf16>
    %c0_2 = arith.constant 0 : index
    %c0_3 = arith.constant 0 : index
    %5 = vector.load %arg2[%c0_2, %c0_3] : memref<128x32xbf16, #tpu.memory_space<vmem>>, vector<128x32xbf16>
    %cst = arith.constant dense<0.000000e+00> : vector<128x32xf32>
    %6 = tpu.matmul %4, %5, %cst {dimension_numbers = #tpu.dot_dimension_numbers<[1], [0], [0], [1], [0, 0, 1, 1], [], []>} : vector<128x128xbf16>, vector<128x32xbf16>, vector<128x32xf32> -> vector<128x32xf32>
    %7 = arith.truncf %6 : vector<128x32xf32> to vector<128x32xbf16>
    %c0_4 = arith.constant 0 : index
    %c0_5 = arith.constant 0 : index
    %8 = vector.load %arg3[%c0_4, %c0_5] : memref<32x32xbf16, #tpu.memory_space<vmem>>, vector<32x32xbf16>
    %cst_6 = arith.constant dense<0.000000e+00> : vector<128x32xf32>
    %9 = tpu.matmul %7, %8, %cst_6 {dimension_numbers = #tpu.dot_dimension_numbers<[1], [0], [0], [1], [0, 0, 1, 1], [], []>} : vector<128x32xbf16>, vector<32x32xbf16>, vector<128x32xf32> -> vector<128x32xf32>
    %c0_7 = arith.constant 0 : index
    %c0_8 = arith.constant 0 : index
    %10 = vector.load %arg4[%c0_7, %c0_8] : memref<1x32xf32, #tpu.memory_space<vmem>>, vector<1x32xf32>
    %11 = vector.broadcast %10 : vector<1x32xf32> to vector<128x32xf32>
    %12 = arith.addf %9, %11 : vector<128x32xf32>
    %cst_9 = arith.constant 5.000000e-01 : f32
    %13 = vector.broadcast %cst_9 : f32 to vector<128x32xf32>
    %14 = arith.mulf %13, %12 : vector<128x32xf32>
    %15 = math.tanh %14 : vector<128x32xf32>
    %cst_10 = arith.constant 1.000000e+00 : f32
    %16 = vector.broadcast %cst_10 : f32 to vector<128x32xf32>
    %17 = arith.addf %15, %16 : vector<128x32xf32>
    %cst_11 = arith.constant 5.000000e-01 : f32
    %18 = vector.broadcast %cst_11 : f32 to vector<128x32xf32>
    %19 = arith.mulf %18, %17 : vector<128x32xf32>
    %20 = arith.truncf %19 : vector<128x32xf32> to vector<128x32xbf16>
    %c0_12 = arith.constant 0 : index
    %c0_13 = arith.constant 0 : index
    %21 = vector.load %arg5[%c0_12, %c0_13] : memref<32x256xbf16, #tpu.memory_space<vmem>>, vector<32x256xbf16>
    %cst_14 = arith.constant dense<0.000000e+00> : vector<128x256xf32>
    %22 = tpu.matmul %20, %21, %cst_14 {dimension_numbers = #tpu.dot_dimension_numbers<[1], [0], [0], [1], [0, 0, 1, 1], [], []>} : vector<128x32xbf16>, vector<32x256xbf16>, vector<128x256xf32> -> vector<128x256xf32>
    %c0_15 = arith.constant 0 : index
    %c0_16 = arith.constant 0 : index
    %23 = vector.load %arg6[%c0_15, %c0_16] : memref<1x256xf32, #tpu.memory_space<vmem>>, vector<1x256xf32>
    %24 = vector.broadcast %23 : vector<1x256xf32> to vector<128x256xf32>
    %25 = arith.addf %22, %24 : vector<128x256xf32>
    %cst_17 = arith.constant dense<0xFF800000> : vector<128xf32>
    %26 = vector.multi_reduction <maximumf>, %25, %cst_17 [1] : vector<128x256xf32> to vector<128xf32>
    %27 = vector.shape_cast %26 : vector<128xf32> to vector<128x1xf32>
    %28 = vector.broadcast %27 : vector<128x1xf32> to vector<128x256xf32>
    %29 = arith.subf %25, %28 : vector<128x256xf32>
    %30 = math.exp %29 : vector<128x256xf32>
    %cst_18 = arith.constant dense<0.000000e+00> : vector<128xf32>
    %31 = vector.multi_reduction <add>, %30, %cst_18 [1] : vector<128x256xf32> to vector<128xf32>
    %32 = vector.shape_cast %31 : vector<128xf32> to vector<128x1xf32>
    %33 = tpu.reciprocal %32 {approx = true} : vector<128x1xf32> -> vector<128x1xf32>
    %34 = arith.mulf %32, %33 : vector<128x1xf32>
    %cst_19 = arith.constant 2.000000e+00 : f32
    %35 = vector.broadcast %cst_19 : f32 to vector<128x1xf32>
    %36 = arith.subf %35, %34 : vector<128x1xf32>
    %37 = arith.mulf %33, %36 : vector<128x1xf32>
    %38 = vector.broadcast %37 : vector<128x1xf32> to vector<128x256xf32>
    %39 = arith.mulf %30, %38 : vector<128x256xf32>
    %c0_20 = arith.constant 0 : index
    %c0_21 = arith.constant 0 : index
    %40 = vector.load %arg9[%c0_20, %c0_21] : memref<128x32xbf16, #tpu.memory_space<vmem>>, vector<128x32xbf16>
    tpu.vector_store %arg9[%c0_20, %c0_21], %20 {strides = array<i32>} : memref<128x32xbf16, #tpu.memory_space<vmem>>, vector<128x32xbf16>,
    %c0_22 = arith.constant 0 : index
    %c0_23 = arith.constant 0 : index
    %41 = vector.load %arg10[%c0_22, %c0_23] : memref<2x256xf32, #tpu.memory_space<vmem>>, vector<2x256xf32>
    %c0_24 = arith.constant 0 : index
    %c0_25 = arith.constant 0 : index
    %42 = vector.load %arg7[%c0_24, %c0_25] : memref<2x128xbf16, #tpu.memory_space<vmem>>, vector<2x128xbf16>
    %43 = arith.truncf %39 : vector<128x256xf32> to vector<128x256xbf16>
    %cst_26 = arith.constant dense<0.000000e+00> : vector<2x256xf32>
    %44 = tpu.matmul %42, %43, %cst_26 {dimension_numbers = #tpu.dot_dimension_numbers<[1], [0], [0], [1], [0, 0, 1, 1], [], []>} : vector<2x128xbf16>, vector<128x256xbf16>, vector<2x256xf32> -> vector<2x256xf32>
    %45 = arith.addf %41, %44 : vector<2x256xf32>
    %c0_27 = arith.constant 0 : index
    %c0_28 = arith.constant 0 : index
    %46 = vector.load %arg10[%c0_27, %c0_28] : memref<2x256xf32, #tpu.memory_space<vmem>>, vector<2x256xf32>
    tpu.vector_store %arg10[%c0_27, %c0_28], %45 {strides = array<i32>} : memref<2x256xf32, #tpu.memory_space<vmem>>, vector<2x256xf32>,
    return
  }
  func.func @transform_0(%arg0: i32) -> (i32, i32) {
    %c0_i32 = arith.constant 0 : i32
    %c0_i32_0 = arith.constant 0 : i32
    return %arg0, %c0_i32 : i32, i32
  }
  func.func @transform_1(%arg0: i32) -> (i32, i32) {
    %c0_i32 = arith.constant 0 : i32
    %c0_i32_0 = arith.constant 0 : i32
    %c0_i32_1 = arith.constant 0 : i32
    return %c0_i32, %c0_i32_0 : i32, i32
  }
  func.func @transform_2(%arg0: i32) -> (i32, i32) {
    %c0_i32 = arith.constant 0 : i32
    %c0_i32_0 = arith.constant 0 : i32
    %c0_i32_1 = arith.constant 0 : i32
    return %c0_i32, %c0_i32_0 : i32, i32
  }
  func.func @transform_3(%arg0: i32) -> (i32, i32) {
    %c0_i32 = arith.constant 0 : i32
    %c0_i32_0 = arith.constant 0 : i32
    %c0_i32_1 = arith.constant 0 : i32
    return %c0_i32, %c0_i32_0 : i32, i32
  }
  func.func @transform_4(%arg0: i32) -> (i32, i32) {
    %c0_i32 = arith.constant 0 : i32
    %c0_i32_0 = arith.constant 0 : i32
    %c0_i32_1 = arith.constant 0 : i32
    return %c0_i32, %c0_i32_0 : i32, i32
  }
  func.func @transform_5(%arg0: i32) -> (i32, i32) {
    %c0_i32 = arith.constant 0 : i32
    %c0_i32_0 = arith.constant 0 : i32
    %c0_i32_1 = arith.constant 0 : i32
    return %c0_i32, %c0_i32_0 : i32, i32
  }
  func.func @transform_6(%arg0: i32) -> (i32, i32) {
    %c0_i32 = arith.constant 0 : i32
    %c0_i32_0 = arith.constant 0 : i32
    return %c0_i32, %arg0 : i32, i32
  }
  func.func @transform_7(%arg0: i32) -> (i32, i32) {
    %c0_i32 = arith.constant 0 : i32
    %c0_i32_0 = arith.constant 0 : i32
    %c0_i32_1 = arith.constant 0 : i32
    return %c0_i32, %c0_i32_0 : i32, i32
  }
  func.func @transform_8(%arg0: i32) -> (i32, i32) {
    %c0_i32 = arith.constant 0 : i32
    %c0_i32_0 = arith.constant 0 : i32
    return %arg0, %c0_i32 : i32, i32
  }
  func.func @transform_9(%arg0: i32) -> (i32, i32) {
    %c0_i32 = arith.constant 0 : i32
    %c0_i32_0 = arith.constant 0 : i32
    %c0_i32_1 = arith.constant 0 : i32
    return %c0_i32, %c0_i32_0 : i32, i32
  }
}

</mosaic_0001>

<bundles_post_ra>
// kernel: neural_fp.3
= control target key start
LH: loop header
LB: loop body
LE: loop exit
PB: predicated region body
PF: predicated region fallthrough
CT: control target
= control target key end

     0   :  { %15 = vsyncpa [#allocation3], 0  ;;  %s1959_s0 = inlined_call_operand.vmem [shape: s8[128,128], index: 0, kind: input, shape index: {}]   ;;  %s1960_s1 = inlined_call_operand.vmem [shape: bf16[128,32], index: 1, kind: input, shape index: {}]   ;;  %s1961_s2 = inlined_call_operand.vmem [shape: bf16[32,32], index: 2, kind: input, shape index: {}]   ;;  %s1962_s3 = inlined_call_operand.vmem [shape: f32[1,32], index: 3, kind: input, shape index: {}]   ;;  %s1963_s4 = inlined_call_operand.vmem [shape: bf16[32,256], index: 4, kind: input, shape index: {}]   ;;  %s1964_s5 = inlined_call_operand.vmem [shape: f32[1,256], index: 5, kind: input, shape index: {}]   ;;  %s1965_s6 = inlined_call_operand.vmem [shape: bf16[2,128], index: 6, kind: input, shape index: {}]   ;;  %s1966_s7 = inlined_call_operand.vmem [shape: f32[2,256], index: 7, kind: input, shape index: {}]   ;;  %s1967_s8 = inlined_call_operand.hbm [shape: bf16[128,32], index: 8, kind: output, shape index: {0}]   ;;  %s1968_s9 = inlined_call_operand.hbm [shape: f32[2,256], index: 9, kind: output, shape index: {1}]  }
   0x1   :  { %v1221_v0 = vld [vmem:[%s1960_s1 + $0x38] sm:$0xff]   ;;  %v1222_v1 = vld [vmem:[%s1960_s1 + $0x30] sm:$0xff]   ;;  %v1223_v2 = vld [vmem:[%s1960_s1 + $0x28] sm:$0xff]  }
   0x2   :  { %1163 = vmatprep.subr.bf16.mxu0 %v1221_v0  ;;  %v1224_v3 = vld [vmem:[%s1960_s1 + $0x20] sm:$0xff]   ;;  %v1225_v6 = vld [vmem:[%s1960_s1 + $0x18] sm:$0xff]  }
   0x3   :  { %1164 = vmatpush3.bf16.msra.mxu0 %v1221_v0  ;;  %v40_v4 = vld [vmem:[%s1959_s0] sm:$0xff] }
   0x4   :  { %1165 = vmatprep.subr.bf16.mxu0 %v1222_v1  ;;  %v44_v5 = vunpack.c.l.s8.bf16 %v40_v4 }
   0x6   :  { %1179 = vmatprep.mubr.bf16.mxu0 %v44_v5 }
   0x7   :  { %1166 = vmatpush3.bf16.msra.mxu0 %v1222_v1 }
   0x8   :  { %1167 = vmatprep.subr.bf16.mxu0 %v1223_v2 }
   0xb   :  { %1168 = vmatpush3.bf16.msra.mxu0 %v1223_v2 }
   0xc   :  { %1169 = vmatprep.subr.bf16.mxu0 %v1224_v3 }
   0xd   :  { %16 = vsyncpa [#allocation5], 0  ;;  %v1226_v7 = vld [vmem:[%s1960_s1 + $0x10] sm:$0xff]   ;;  %v1227_v8 = vld [vmem:[%s1960_s1 + $0x8] sm:$0xff]   ;;  %v45_v11 = vunpack.c.h.s8.bf16 %v40_v4  ;;  %vm244_vm0 = vcmask 261120   ;;  %v1409_v50 = vmov 0  }
   0xe   :  { %v1228_v9 = vld [vmem:[%s1960_s1] sm:$0xff]   ;;  %v41_v10 = vld [vmem:[%s1959_s0 + $0x8] sm:$0xff]  ;;  %v42_v13 = vld [vmem:[%s1959_s0 + $0x10] sm:$0xff]  ;;  %vm955_vm1 = vcmask 257024   ;;  %s1410_s26 = smov [#allocation2]  }
   0xf   :  { %1170 = vmatpush3.bf16.msra.mxu0 %v1224_v3  ;;  %v46_v12 = vunpack.c.l.s8.bf16 %v41_v10  ;;  %v47_v14 = vunpack.c.h.s8.bf16 %v41_v10  ;;  %v48_v15 = vunpack.c.l.s8.bf16 %v42_v13  ;;  %v43_v16 = vld [vmem:[%s1959_s0 + $0x18] sm:$0xff]  ;;  %v49_v17 = vunpack.c.h.s8.bf16 %v42_v13  ;;  %v1229_v20 = vld [vmem:[%s1961_s2 + $0x8] sm:$0xff]   ;;  %v1230_v21 = vld [vmem:[%s1961_s2] sm:$0xff]   ;;  %s1049_s27 = sshll.u32 %s1410_s26, 4  ;;  %s1050_s27 = int_to_ptr.vmem [resolvable:$true] %s1049_s27 }
  0x10   :  { %1171 = vmatprep.subr.bf16.mxu0 %v1225_v6  ;;  %v50_v18 = vunpack.c.l.s8.bf16 %v43_v16  ;;  %v51_v19 = vunpack.c.h.s8.bf16 %v43_v16  ;;  %1195 = vmatprep.subr.bf16.mxu1 %v1229_v20  ;;  %v1233_v22 = vld [vmem:[%s1963_s4 + $0x14] ss:$8 sps:$4 sm:$0xff]   ;;  %v1231_v28 = vld [vmem:[%s1963_s4 + $0x10] ss:$8 sps:$4 sm:$0xff]   ;;  %v1236_v48 = vld [vmem:[%s1963_s4 + $0x4] ss:$8 sps:$4 sm:$0xff]   ;;  %p1370_p1 = scmp.lt.s32.totalorder %s1050_s27, %s1050_s27 }
  0x11   :  { %1196 = vmatpush3.bf16.msra.mxu1 %v1229_v20  ;;  %v1234_v49 = vld [vmem:[%s1963_s4] ss:$8 sps:$4 sm:$0xff]   ;;  %s1365_s28 = scalar_lea.vmem %s1050_s27, 1024 }
  0x12   :  { %1197 = vmatprep.subr.bf16.mxu1 %v1230_v21  ;;  %v1532_v51 = vld [vmem:[%s1962_s3] ss:$0 sm:$0xff]  ;;  %p1366_p0 = scmp.ne.s32.totalorder %s1050_s27, %s1365_s28  ;;  %p1371_p2 = scmp.lt.s32.totalorder %s1365_s28, %s1365_s28 }
  0x13   :  { %1172 = vmatpush3.bf16.msra.mxu0 %v1225_v6 }
  0x14   :  { %1173 = vmatprep.subr.bf16.mxu0 %v1226_v7  ;;  %p1372_p3 = por %p1371_p2, %p1370_p1 }
  0x15   :  { %1198 = vmatpush3.bf16.msra.mxu1 %v1230_v21 }
  0x16   :  { %510 = vmatprep.subr.bf16.mxu1 %v1233_v22  ;;  %p1373_p4 = pnand %p1372_p3, %p1366_p0 }
  0x17   :  { %1174 = vmatpush3.bf16.msra.mxu0 %v1226_v7 }
  0x18   :  { %1175 = vmatprep.subr.bf16.mxu0 %v1227_v8 }
  0x1b   :  { %1176 = vmatpush3.bf16.msra.mxu0 %v1227_v8 }
  0x1c   :  { %1177 = vmatprep.subr.bf16.mxu0 %v1228_v9 }
  0x1f   :  { %1178 = vmatpush3.bf16.msra.mxu0 %v1228_v9 }
  0x22   :  { %1180 = vmatmul.mubr.bf16.vlgmr.msra.gmra.mxu0 %v45_v11 }
  0x23   :  { %1183 = vmatprep.mubr.bf16.mxu0 %v46_v12 }
  0x2a   :  { %1184 = vmatmul.mubr.bf16.gmra.mxu0 %v47_v14 }
  0x2b   :  { %1187 = vmatprep.mubr.bf16.mxu0 %v48_v15 }
  0x32   :  { %1188 = vmatmul.mubr.bf16.gmra.mxu0 %v49_v17 }
  0x33   :  { %1191 = vmatprep.mubr.bf16.mxu0 %v50_v18 }
  0x3a   :  { %1192 = vmatmul.mubr.bf16.gmra.mxu0 %v51_v19 }
  0x3b   :  { %1022 = vmatprep.mubr.bf16.mxu0 %v1409_v50 }
  0xe2   :  { %v1181_v23 = vpop.f32.mrf.mxu0 }
  0xe4   :  { %v150_v24 = vpop.f32.mrf.mxu0 }
  0xe6   :  { %v1182_v25 = vpop.f32.mrf.mxu0 }
  0xe7   :  { %v214_v29 = vpack.c.bf16 %v1182_v25, %v1181_v23 }
  0xe8   :  { %v153_v26 = vpop.f32.mrf.mxu0 }
  0xe9   :  { %v213_v27 = vpack.c.bf16 %v153_v26, %v150_v24 }
  0xea   :  { %v1185_v30 = vpop.f32.mrf.mxu0 }
  0xeb   :  { %1199 = vmatprep.mubr.msk.bf16.mxu1 %vm244_vm0, %v213_v27 }
  0xec   :  { %v166_v31 = vpop.f32.mrf.mxu0  ;;  %1200 = vmatmul.mubr.msk.bf16.vlgmr.msra.gmra.mxu1 %vm244_vm0, %v214_v29 }
  0xed   :  { %511 = vmatpush1.bf16.msra.mxu1 %v1231_v28 }
  0xee   :  { %v1186_v32 = vpop.f32.mrf.mxu0  ;;  %512 = vmatprep.subr.bf16.mxu1 %v1236_v48 }
  0xef   :  { %v216_v33 = vpack.c.bf16 %v1186_v32, %v1185_v30 }
  0xf0   :  { %v169_v34 = vpop.f32.mrf.mxu0 }
  0xf1   :  { %v215_v35 = vpack.c.bf16 %v169_v34, %v166_v31  ;;  %513 = vmatpush1.bf16.msra.mxu1 %v1234_v49 }
  0xf2   :  { %v1189_v36 = vpop.f32.mrf.mxu0 }
  0xf3   :  { %1203 = vmatprep.mubr.msk.bf16.mxu1 %vm244_vm0, %v215_v35 }
  0xf4   :  { %1204 = vmatmul.mubr.msk.bf16.gmra.mxu1 %vm244_vm0, %v216_v33  ;;  %v182_v37 = vpop.f32.mrf.mxu0 }
  0xf6   :  { %v1190_v38 = vpop.f32.mrf.mxu0 }
  0xf7   :  { %v218_v39 = vpack.c.bf16 %v1190_v38, %v1189_v36 }
  0xf8   :  { %v185_v40 = vpop.f32.mrf.mxu0 }
  0xf9   :  { %v217_v41 = vpack.c.bf16 %v185_v40, %v182_v37 }
  0xfa   :  { %v1193_v42 = vpop.f32.mrf.mxu0 }
  0xfb   :  { %1207 = vmatprep.mubr.msk.bf16.mxu1 %vm244_vm0, %v217_v41 }
  0xfc   :  { %1208 = vmatmul.mubr.msk.bf16.gmra.mxu1 %vm244_vm0, %v218_v39  ;;  %v198_v43 = vpop.f32.mrf.mxu0 }
  0xfe   :  { %v1194_v44 = vpop.f32.mrf.mxu0 }
  0xff   :  { %v220_v45 = vpack.c.bf16 %v1194_v44, %v1193_v42 }
 0x100   :  { %v201_v46 = vpop.f32.mrf.mxu0 }
 0x101   :  { %v219_v47 = vpack.c.bf16 %v201_v46, %v198_v43 }
 0x103   :  { %1211 = vmatprep.mubr.msk.bf16.mxu1 %vm244_vm0, %v219_v47 }
 0x104   :  { %1212 = vmatmul.mubr.msk.bf16.gmra.mxu1 %vm244_vm0, %v220_v45 }
 0x105   :  { %530 = vmatprep.mubr.bf16.mxu1 %v1409_v50 }
 0x1ac   :  { %v1201_v52 = vpop.f32.mrf.mxu1 }
 0x1ad   :  { %v312_v53 = vadd.f32 %v1201_v52, %v1532_v51 }
 0x1ae   :  { %v303_v54 = vpop.f32.mrf.mxu1 }
 0x1af   :  { %v368_v55 = vmul.f32 0.5, %v312_v53  ;;  %v304_v56 = vadd.f32 %v1532_v51, %v303_v54 }
 0x1b0   :  { %v1202_v57 = vpop.f32.mrf.mxu1 }
 0x1b1   :  { %1237 = vtanh.f32 %v368_v55  ;;  %v366_v58 = vmul.f32 0.5, %v304_v56  ;;  %v315_v59 = vadd.f32 %v1202_v57, %v1532_v51 }
 0x1b2   :  { %v306_v60 = vpop.f32.mrf.mxu1 }
 0x1b3   :  { %1239 = vtanh.f32 %v366_v58  ;;  %v369_v61 = vmul.f32 0.5, %v315_v59  ;;  %v307_v62 = vadd.f32 %v1532_v51, %v306_v60 }
 0x1b4   :  { %v1205_v63 = vpop.f32.mrf.mxu1 }
 0x1b5   :  { %1241 = vtanh.f32 %v369_v61  ;;  %v367_v0 = vmul.f32 0.5, %v307_v62  ;;  %v328_v1 = vadd.f32 %v1205_v63, %v1532_v51 }
 0x1b6   :  { %v319_v2 = vpop.f32.mrf.mxu1 }
 0x1b7   :  { %1243 = vtanh.f32 %v367_v0  ;;  %v372_v3 = vmul.f32 0.5, %v328_v1  ;;  %v320_v4 = vadd.f32 %v1532_v51, %v319_v2 }
 0x1b8   :  { %v1206_v5 = vpop.f32.mrf.mxu1 }
 0x1b9   :  { %1245 = vtanh.f32 %v372_v3  ;;  %v370_v6 = vmul.f32 0.5, %v320_v4  ;;  %v331_v7 = vadd.f32 %v1206_v5, %v1532_v51 }
 0x1ba   :  { %v322_v8 = vpop.f32.mrf.mxu1 }
 0x1bb   :  { %1247 = vtanh.f32 %v370_v6  ;;  %v373_v9 = vmul.f32 0.5, %v331_v7  ;;  %v323_v10 = vadd.f32 %v1532_v51, %v322_v8 }
 0x1bc   :  { %v1209_v11 = vpop.f32.mrf.mxu1 }
 0x1bd   :  { %1249 = vtanh.f32 %v373_v9  ;;  %v371_v12 = vmul.f32 0.5, %v323_v10  ;;  %v344_v13 = vadd.f32 %v1209_v11, %v1532_v51 }
 0x1be   :  { %v1238_v14 = vpop.eup %1237  ;;  %v335_v15 = vpop.f32.mrf.mxu1 }
 0x1bf   :  { %v400_v16 = vadd.f32 1.0, %v1238_v14  ;;  %1251 = vtanh.f32 %v371_v12  ;;  %v376_v17 = vmul.f32 0.5, %v344_v13  ;;  %v336_v18 = vadd.f32 %v1532_v51, %v335_v15 }
 0x1c0   :  { %v1240_v19 = vpop.eup %1239  ;;  %v1210_v20 = vpop.f32.mrf.mxu1 }
 0x1c1   :  { %v1544_v21 = vmul.f32 0.5, %v400_v16  ;;  %v398_v22 = vadd.f32 1.0, %v1240_v19  ;;  %1253 = vtanh.f32 %v376_v17  ;;  %v374_v23 = vmul.f32 0.5, %v336_v18 }
 0x1c2   :  { %v1242_v24 = vpop.eup %1241  ;;  %v347_v25 = vadd.f32 %v1210_v20, %v1532_v51  ;;  %v338_v26 = vpop.f32.mrf.mxu1 }
 0x1c3   :  { %v1123_v27 = vpack.c.bf16 %v1544_v21, %v1544_v21  ;;  %v414_v28 = vmul.f32 0.5, %v398_v22  ;;  %v401_v29 = vadd.f32 1.0, %v1242_v24  ;;  %1255 = vtanh.f32 %v374_v23 }
 0x1c4   :  { %v1244_v30 = vpop.eup %1243  ;;  %v377_v31 = vmul.f32 0.5, %v347_v25  ;;  %v339_v32 = vadd.f32 %v1532_v51, %v338_v26  ;;  %v1213_v33 = vpop.f32.mrf.mxu1 }
 0x1c5   :  { %958 = vst.msk [vmem:[#allocation2 + $0x8] sm:$0xf] %vm955_vm1, %v1123_v27  ;;  %v1121_v34 = vpack.c.bf16 %v414_v28, %v414_v28  ;;  %v417_v35 = vmul.f32 0.5, %v401_v29  ;;  %v399_v36 = vadd.f32 1.0, %v1244_v30  ;;  %v360_v37 = vadd.f32 %v1213_v33, %v1532_v51 }
 0x1c6   :  { %v1246_v38 = vpop.eup %1245  ;;  %1257 = vtanh.f32 %v377_v31  ;;  %v375_v39 = vmul.f32 0.5, %v339_v32  ;;  %v351_v40 = vpop.f32.mrf.mxu1 }
 0x1c7   :  { %956 = vst.msk [vmem:[#allocation2] sm:$0xf] %vm955_vm1, %v1121_v34  ;;  %v1124_v41 = vpack.c.bf16 %v417_v35, %v417_v35  ;;  %v415_v42 = vmul.f32 0.5, %v399_v36  ;;  %v404_v43 = vadd.f32 1.0, %v1246_v38  ;;  %v380_v44 = vmul.f32 0.5, %v360_v37 }
 0x1c8   :  { %v1248_v45 = vpop.eup %1247  ;;  %1259 = vtanh.f32 %v375_v39  ;;  %v352_v46 = vadd.f32 %v1532_v51, %v351_v40  ;;  %v1214_v47 = vpop.f32.mrf.mxu1  ;;  %v431_v11 = vpack.c.bf16 %v417_v35, %v1544_v21 }
 0x1c9   :  { %959 = vst.msk [vmem:[#allocation2 + $0xc] sm:$0xf] %vm955_vm1, %v1124_v41  ;;  %v430_v48 = vpack.c.bf16 %v415_v42, %v414_v28  ;;  %v1122_v49 = vpack.c.bf16 %v415_v42, %v415_v42  ;;  %v1555_v52 = vmul.f32 0.5, %v404_v43  ;;  %v402_v53 = vadd.f32 1.0, %v1248_v45 }
 0x1ca   :  { %v1250_v54 = vpop.eup %1249  ;;  %1261 = vtanh.f32 %v380_v44  ;;  %v378_v55 = vmul.f32 0.5, %v352_v46  ;;  %v363_v56 = vadd.f32 %v1214_v47, %v1532_v51  ;;  %v354_v57 = vpop.f32.mrf.mxu1 }
 0x1cb   :  { %957 = vst.msk [vmem:[#allocation2 + $0x4] sm:$0xf] %vm955_vm1, %v1122_v49  ;;  %v1127_v58 = vpack.c.bf16 %v1555_v52, %v1555_v52  ;;  %v418_v59 = vmul.f32 0.5, %v402_v53  ;;  %v405_v60 = vadd.f32 1.0, %v1250_v54  ;;  %1097 = vmatmul.mubr.msk.bf16.vlgmr.msra.gmra.mxu1 %vm244_vm0, %v430_v48  ;;  %v355_v61 = vadd.f32 %v1532_v51, %v354_v57 }
 0x1cc   :  { %v1252_v62 = vpop.eup %1251  ;;  %1263 = vtanh.f32 %v378_v55  ;;  %540 = vmatprep.mubr.bf16.mxu1 %v1409_v50  ;;  %v381_v63 = vmul.f32 0.5, %v363_v56 }
 0x1cd   :  { %962 = vst.msk [vmem:[#allocation2 + $0x18] sm:$0xf] %vm955_vm1, %v1127_v58  ;;  %v1125_v0 = vpack.c.bf16 %v418_v59, %v418_v59  ;;  %v421_v1 = vmul.f32 0.5, %v405_v60  ;;  %v403_v2 = vadd.f32 1.0, %v1252_v62  ;;  %v379_v3 = vmul.f32 0.5, %v355_v61 }
 0x1ce   :  { %v1254_v4 = vpop.eup %1253  ;;  %1265 = vtanh.f32 %v381_v63 }
 0x1cf   :  { %960 = vst.msk [vmem:[#allocation2 + $0x10] sm:$0xf] %vm955_vm1, %v1125_v0  ;;  %v1128_v5 = vpack.c.bf16 %v421_v1, %v421_v1  ;;  %v419_v6 = vmul.f32 0.5, %v403_v2  ;;  %v408_v7 = vadd.f32 1.0, %v1254_v4  ;;  %1267 = vtanh.f32 %v379_v3 }
 0x1d0   :  { %v1256_v51 = vpop.eup %1255  ;;  %v433_v40 = vpack.c.bf16 %v421_v1, %v1555_v52  ;;  %v444_v1 = vlaneseq }
 0x1d1   :  { %963 = vst.msk [vmem:[#allocation2 + $0x1c] sm:$0xf] %vm955_vm1, %v1128_v5  ;;  %v1126_v8 = vpack.c.bf16 %v419_v6, %v419_v6  ;;  %v424_v9 = vmul.f32 0.5, %v408_v7  ;;  %v406_v10 = vadd.f32 1.0, %v1256_v51  ;;  %v432_v25 = vpack.c.bf16 %v419_v6, %v418_v59 }
 0x1d2   :  { %v1615_v4 = vshrl.u32 %v444_v1, 7 }
 0x1d3   :  { %v1258_v12 = vpop.eup %1257  ;;  %961 = vst.msk [vmem:[#allocation2 + $0x14] sm:$0xf] %vm955_vm1, %v1126_v8  ;;  %v1131_v13 = vpack.c.bf16 %v424_v9, %v424_v9  ;;  %v422_v14 = vmul.f32 0.5, %v406_v10  ;;  %1098 = vmatmul.mubr.msk.bf16.gmra.mxu1 %vm244_vm0, %v431_v11  ;;  %v442_v8 = vld [vmem:[%s1964_s5] sm:$0x3] }
 0x1d4   :  { %v409_v15 = vadd.f32 1.0, %v1258_v12  ;;  %550 = vmatprep.mubr.bf16.mxu1 %v1409_v50  ;;  %v446_v7 = vsub.s32 0, %v1615_v4  ;;  %v450_v51 = vsub.s32 1, %v1615_v4 }
 0x1d5   :  { %v1260_v16 = vpop.eup %1259  ;;  %966 = vst.msk [vmem:[#allocation2 + $0x28] sm:$0xf] %vm955_vm1, %v1131_v13  ;;  %v1129_v17 = vpack.c.bf16 %v422_v14, %v422_v14 }
 0x1d6   :  { %v425_v18 = vmul.f32 0.5, %v409_v15  ;;  %v407_v19 = vadd.f32 1.0, %v1260_v16  ;;  %v1622_v11 = vrot.slane %v442_v8, %v446_v7  ;;  %v1624_v12 = vrot.slane %v442_v8, %v450_v51 }
 0x1d7   :  { %v1262_v20 = vpop.eup %1261  ;;  %964 = vst.msk [vmem:[#allocation2 + $0x20] sm:$0xf] %vm955_vm1, %v1129_v17 }
 0x1d8   :  { %v1132_v21 = vpack.c.bf16 %v425_v18, %v425_v18  ;;  %v423_v22 = vmul.f32 0.5, %v407_v19  ;;  %v412_v23 = vadd.f32 1.0, %v1262_v20  ;;  %v435_v42 = vpack.c.bf16 %v425_v18, %v424_v9 }
 0x1d9   :  { %v1264_v24 = vpop.eup %1263 }
 0x1da   :  { %967 = vst.msk [vmem:[#allocation2 + $0x2c] sm:$0xf] %vm955_vm1, %v1132_v21  ;;  %v1130_v26 = vpack.c.bf16 %v423_v22, %v423_v22  ;;  %v428_v27 = vmul.f32 0.5, %v412_v23  ;;  %v410_v28 = vadd.f32 1.0, %v1264_v24  ;;  %v434_v41 = vpack.c.bf16 %v423_v22, %v422_v14 }
 0x1db   :  { %v1266_v29 = vpop.eup %1265  ;;  %1099 = vmatmul.mubr.msk.bf16.gmra.mxu1 %vm244_vm0, %v432_v25 }
 0x1dc   :  { %v1268_v30 = vpop.eup %1267  ;;  %965 = vst.msk [vmem:[#allocation2 + $0x24] sm:$0xf] %vm955_vm1, %v1130_v26  ;;  %v1135_v31 = vpack.c.bf16 %v428_v27, %v428_v27  ;;  %v426_v32 = vmul.f32 0.5, %v410_v28  ;;  %v413_v33 = vadd.f32 1.0, %v1266_v29  ;;  %560 = vmatprep.mubr.bf16.mxu1 %v1409_v50 }
 0x1dd   :  { %v411_v34 = vadd.f32 1.0, %v1268_v30 }
 0x1de   :  { %970 = vst.msk [vmem:[#allocation2 + $0x38] sm:$0xf] %vm955_vm1, %v1135_v31  ;;  %v1133_v35 = vpack.c.bf16 %v426_v32, %v426_v32  ;;  %v429_v36 = vmul.f32 0.5, %v413_v33 }
 0x1df   :  { %v427_v37 = vmul.f32 0.5, %v411_v34 }
 0x1e0   :  { %968 = vst.msk [vmem:[#allocation2 + $0x30] sm:$0xf] %vm955_vm1, %v1133_v35  ;;  %v1136_v38 = vpack.c.bf16 %v429_v36, %v429_v36  ;;  %v437_v44 = vpack.c.bf16 %v429_v36, %v428_v27 }
 0x1e1   :  { %v1134_v39 = vpack.c.bf16 %v427_v37, %v427_v37  ;;  %v436_v43 = vpack.c.bf16 %v427_v37, %v426_v32 }
 0x1e2   :  { %971 = vst.msk [vmem:[#allocation2 + $0x3c] sm:$0xf] %vm955_vm1, %v1136_v38 }
 0x1e3   :  { %969 = vst.msk [vmem:[#allocation2 + $0x34] sm:$0xf] %vm955_vm1, %v1134_v39  ;;  %1100 = vmatmul.mubr.msk.bf16.gmra.mxu1 %vm244_vm0, %v433_v40 }
 0x1e4   :  { %570 = vmatprep.mubr.bf16.mxu1 %v1409_v50 }
 0x1eb   :  { %1101 = vmatmul.mubr.msk.bf16.gmra.mxu1 %vm244_vm0, %v434_v41 }
 0x1ec   :  { %580 = vmatprep.mubr.bf16.mxu1 %v1409_v50 }
 0x1f3   :  { %1102 = vmatmul.mubr.msk.bf16.gmra.mxu1 %vm244_vm0, %v435_v42 }
 0x1f4   :  { %590 = vmatprep.mubr.bf16.mxu1 %v1409_v50 }
 0x1fb   :  { %1103 = vmatmul.mubr.msk.bf16.gmra.mxu1 %vm244_vm0, %v436_v43 }
 0x1fc   :  { %600 = vmatprep.mubr.bf16.mxu1 %v1409_v50 }
 0x203   :  { %1104 = vmatmul.mubr.msk.bf16.gmra.mxu1 %vm244_vm0, %v437_v44 }
 0x28b   :  { %v1591_v45 = vpop.f32.mrf.mxu1 }
 0x28c   :  { %v1762_v7 = vadd.f32 %v1591_v45, %v1622_v11 }
 0x28d   :  { %v1593_v46 = vpop.f32.mrf.mxu1 }
 0x28f   :  { %v1595_v47 = vpop.f32.mrf.mxu1 }
 0x291   :  { %v1597_v48 = vpop.f32.mrf.mxu1 }
 0x293   :  { %v1599_v49 = vpop.f32.mrf.mxu1 }
 0x295   :  { %v1601_v52 = vpop.f32.mrf.mxu1 }
 0x297   :  { %v1603_v53 = vpop.f32.mrf.mxu1 }
 0x299   :  { %v1605_v54 = vpop.f32.mrf.mxu1 }
 0x29b   :  { %v1607_v50 = vpop.f32.mrf.mxu1 }
 0x29d   :  { %v1609_v55 = vpop.f32.mrf.mxu1 }
 0x29f   :  { %v556_v56 = vpop.f32.mrf.mxu1 }
 0x2a1   :  { %v558_v57 = vpop.f32.mrf.mxu1 }
 0x2a2   :  { %v1687_v42 = vadd.f32 %v558_v57, %v1624_v12  ;;  %v1704_v57 = vadd.f32 %v1605_v54, %v1624_v12  ;;  %v1724_v54 = vadd.f32 %v1597_v48, %v1624_v12  ;;  %v1744_v48 = vadd.f32 %v1601_v52, %v1624_v12 }
 0x2a3   :  { %v1611_v58 = vpop.f32.mrf.mxu1 }
 0x2a5   :  { %v1613_v59 = vpop.f32.mrf.mxu1 }
 0x2a7   :  { %v566_v60 = vpop.f32.mrf.mxu1 }
 0x2a8   :  { %v1681_v40 = vadd.f32 %v566_v60, %v1622_v11  ;;  %v1697_v60 = vadd.f32 %v556_v56, %v1622_v11 }
 0x2a9   :  { %v568_v61 = vpop.f32.mrf.mxu1 }
 0x2aa   :  { %v1671_v36 = vadd.f32 %v568_v61, %v1624_v12  ;;  %v626_v56 = vmax.f32 %v1697_v60, %v1687_v42 }
 0x2ab   :  { %v572_v62 = vpop.f32.mrf.mxu1 }
 0x2ac   :  { %v632_v61 = vmax.f32 %v1681_v40, %v1671_v36 }
 0x2ad   :  { %v574_v63 = vpop.f32.mrf.mxu1 }
 0x2ae   :  { %v1690_v43 = vadd.f32 %v574_v63, %v1624_v12  ;;  %v1708_v63 = vadd.f32 %v1613_v59, %v1624_v12  ;;  %v1728_v59 = vadd.f32 %v1609_v55, %v1624_v12 }
 0x2af   :  { %v576_v0 = vpop.f32.mrf.mxu1 }
 0x2b0   :  { %v1662_v33 = vadd.f32 %v576_v0, %v1622_v11  ;;  %v1700_v0 = vadd.f32 %v572_v62, %v1622_v11  ;;  %v1716_v62 = vadd.f32 %v1603_v53, %v1622_v11 }
 0x2b1   :  { %v578_v2 = vpop.f32.mrf.mxu1 }
 0x2b2   :  { %v1655_v29 = vadd.f32 %v578_v2, %v1624_v12  ;;  %v635_v1 = vmax.f32 %v1700_v0, %v1690_v43  ;;  %v1720_v2 = vadd.f32 %v1611_v58, %v1622_v11  ;;  %v620_v53 = vmax.f32 %v1716_v62, %v1704_v57 }
 0x2b3   :  { %v582_v3 = vpop.f32.mrf.mxu1  ;;  %v1736_v58 = vadd.f32 %v1595_v47, %v1622_v11  ;;  %v1752_v47 = vadd.f32 %v1599_v49, %v1622_v11 }
 0x2b4   :  { %v638_v39 = vmax.f32 %v1662_v33, %v1655_v29  ;;  %v1684_v41 = vadd.f32 %v582_v3, %v1622_v11  ;;  %v629_v3 = vmax.f32 %v1720_v2, %v1708_v63 }
 0x2b5   :  { %v584_v5 = vpop.f32.mrf.mxu1  ;;  %v617_v52 = vmax.f32 %v1752_v47, %v1744_v48 }
 0x2b6   :  { %v1674_v37 = vadd.f32 %v584_v5, %v1624_v12  ;;  %v1740_v5 = vadd.f32 %v1607_v50, %v1622_v11  ;;  %v1756_v50 = vadd.f32 %v1593_v46, %v1624_v12 }
 0x2b7   :  { %v586_v6 = vpop.f32.mrf.mxu1 }
 0x2b8   :  { %v1646_v25 = vadd.f32 %v586_v6, %v1622_v11  ;;  %v641_v44 = vmax.f32 %v1684_v41, %v1674_v37  ;;  %v623_v55 = vmax.f32 %v1740_v5, %v1728_v59  ;;  %v614_v6 = vmax.f32 %v1736_v58, %v1724_v54 }
 0x2b9   :  { %v588_v9 = vpop.f32.mrf.mxu1  ;;  %v611_v51 = vmax.f32 %v1762_v7, %v1756_v50 }
 0x2ba   :  { %v1641_v22 = vadd.f32 %v588_v9, %v1624_v12 }
 0x2bb   :  { %v592_v10 = vpop.f32.mrf.mxu1 }
 0x2bc   :  { %v1627_v14 = vadd.f32 %v592_v10, %v1622_v11  ;;  %v644_v31 = vmax.f32 %v1646_v25, %v1641_v22 }
 0x2bd   :  { %v594_v13 = vpop.f32.mrf.mxu1 }
 0x2be   :  { %v1630_v15 = vadd.f32 %v594_v13, %v1624_v12 }
 0x2bf   :  { %v596_v16 = vpop.f32.mrf.mxu1 }
 0x2c0   :  { %v647_v17 = vmax.f32 %v1627_v14, %v1630_v15  ;;  %v1635_v19 = vadd.f32 %v596_v16, %v1622_v11 }
 0x2c1   :  { %v598_v18 = vpop.f32.mrf.mxu1 }
 0x2c2   :  { %v1638_v20 = vadd.f32 %v598_v18, %v1624_v12  ;;  %648 = vmax.xlane.f32.xlu1 %v647_v17 }
 0x2c3   :  { %v602_v21 = vpop.f32.mrf.mxu1 }
 0x2c4   :  { %v650_v23 = vmax.f32 %v1635_v19, %v1638_v20  ;;  %v1649_v26 = vadd.f32 %v602_v21, %v1622_v11 }
 0x2c5   :  { %v604_v24 = vpop.f32.mrf.mxu1 }
 0x2c6   :  { %v1652_v27 = vadd.f32 %v604_v24, %v1624_v12  ;;  %651 = vmax.xlane.f32.xlu1 %v650_v23 }
 0x2c7   :  { %v606_v28 = vpop.f32.mrf.mxu1 }
 0x2c8   :  { %v653_v30 = vmax.f32 %v1649_v26, %v1652_v27  ;;  %v1665_v34 = vadd.f32 %v606_v28, %v1622_v11 }
 0x2c9   :  { %v608_v32 = vpop.f32.mrf.mxu1 }
 0x2ca   :  { %v1668_v35 = vadd.f32 %v608_v32, %v1624_v12  ;;  %654 = vmax.xlane.f32.xlu0 %v653_v30  ;;  %645 = vmax.xlane.f32.xlu1 %v644_v31 }
 0x2cc   :  { %v656_v38 = vmax.f32 %v1665_v34, %v1668_v35 }
 0x2ce   :  { %657 = vmax.xlane.f32.xlu0 %v656_v38  ;;  %639 = vmax.xlane.f32.xlu1 %v638_v39 }
 0x2d2   :  { %642 = vmax.xlane.f32.xlu0 %v641_v44  ;;  %633 = vmax.xlane.f32.xlu1 %v632_v61 }
 0x2d6   :  { %636 = vmax.xlane.f32.xlu0 %v635_v1  ;;  %627 = vmax.xlane.f32.xlu1 %v626_v56 }
 0x2da   :  { %630 = vmax.xlane.f32.xlu0 %v629_v3  ;;  %621 = vmax.xlane.f32.xlu1 %v620_v53 }
 0x2de   :  { %624 = vmax.xlane.f32.xlu0 %v623_v55  ;;  %615 = vmax.xlane.f32.xlu1 %v614_v6 }
 0x2e2   :  { %618 = vmax.xlane.f32.xlu0 %v617_v52 }
 0x2e6   :  { %612 = vmax.xlane.f32.xlu0 %v611_v51 }
 0x34b   :  { %v649_v49 = vpop.xlane.xlu1 %648 }
 0x34c   :  { %v683_v8 = vsub.f32 %v1627_v14, %v649_v49  ;;  %v684_v9 = vsub.f32 %v1630_v15, %v649_v49 }
 0x34e   :  { %v739_v46 = vmul.f32 1.442695, %v683_v8  ;;  %v741_v13 = vmul.f32 1.442695, %v684_v9 }
 0x34f   :  { %v652_v10 = vpop.xlane.xlu1 %651 }
 0x350   :  { %v685_v12 = vsub.f32 %v1635_v19, %v652_v10  ;;  %v686_v16 = vsub.f32 %v1638_v20, %v652_v10  ;;  %1269 = vpow2.f32 %v739_v46 }
 0x351   :  { %1271 = vpow2.f32 %v741_v13 }
 0x352   :  { %v743_v21 = vmul.f32 1.442695, %v685_v12  ;;  %v745_v15 = vmul.f32 1.442695, %v686_v16 }
 0x353   :  { %v655_v17 = vpop.xlane.xlu0 %654  ;;  %v646_v45 = vpop.xlane.xlu1 %645 }
 0x354   :  { %v687_v11 = vsub.f32 %v1649_v26, %v655_v17  ;;  %v688_v18 = vsub.f32 %v1652_v27, %v655_v17  ;;  %v681_v14 = vsub.f32 %v1646_v25, %v646_v45  ;;  %v682_v28 = vsub.f32 %v1641_v22, %v646_v45 }
 0x356   :  { %v747_v23 = vmul.f32 1.442695, %v687_v11  ;;  %v749_v24 = vmul.f32 1.442695, %v688_v18  ;;  %v735_v26 = vmul.f32 1.442695, %v681_v14 }
 0x357   :  { %v658_v19 = vpop.xlane.xlu0 %657  ;;  %v640_v30 = vpop.xlane.xlu1 %639  ;;  %v737_v38 = vmul.f32 1.442695, %v682_v28 }
 0x358   :  { %1273 = vpow2.f32 %v747_v23  ;;  %v689_v20 = vsub.f32 %v1665_v34, %v658_v19  ;;  %v690_v31 = vsub.f32 %v1668_v35, %v658_v19  ;;  %v677_v25 = vsub.f32 %v1662_v33, %v640_v30 }
 0x359   :  { %1275 = vpow2.f32 %v749_v24  ;;  %v678_v34 = vsub.f32 %v1655_v29, %v640_v30 }
 0x35a   :  { %1277 = vpow2.f32 %v743_v21  ;;  %v751_v27 = vmul.f32 1.442695, %v689_v20  ;;  %v753_v32 = vmul.f32 1.442695, %v690_v31  ;;  %v727_v56 = vmul.f32 1.442695, %v677_v25 }
 0x35b   :  { %1279 = vpow2.f32 %v745_v15  ;;  %v643_v39 = vpop.xlane.xlu0 %642  ;;  %v634_v44 = vpop.xlane.xlu1 %633 }
 0x35c   :  { %1281 = vpow2.f32 %v751_v27  ;;  %v679_v22 = vsub.f32 %v1684_v41, %v643_v39  ;;  %v680_v61 = vsub.f32 %v1674_v37, %v643_v39  ;;  %v673_v3 = vsub.f32 %v1681_v40, %v634_v44 }
 0x35d   :  { %1283 = vpow2.f32 %v753_v32  ;;  %v1783_v41 = vpop.eup %1269  ;;  %v729_v37 = vmul.f32 1.442695, %v678_v34  ;;  %v674_v52 = vsub.f32 %v1671_v36, %v634_v44 }
 0x35e   :  { %1285 = vpow2.f32 %v735_v26  ;;  %v731_v35 = vmul.f32 1.442695, %v679_v22  ;;  %v733_v1 = vmul.f32 1.442695, %v680_v61  ;;  %v719_v49 = vmul.f32 1.442695, %v673_v3  ;;  %v1787_v9 = vpop.eup %1271 }
 0x35f   :  { %1287 = vpow2.f32 %v737_v38  ;;  %v637_v53 = vpop.xlane.xlu0 %636  ;;  %v628_v55 = vpop.xlane.xlu1 %627  ;;  %v721_v36 = vmul.f32 1.442695, %v674_v52  ;;  %v791_v24 = vadd.f32 %v1787_v9, %v1783_v41 }
 0x360   :  { %1289 = vpow2.f32 %v731_v35  ;;  %v675_v33 = vsub.f32 %v1700_v0, %v637_v53  ;;  %v676_v6 = vsub.f32 %v1690_v43, %v637_v53  ;;  %v669_v8 = vsub.f32 %v1697_v60, %v628_v55 }
 0x361   :  { %1291 = vpow2.f32 %v733_v1  ;;  %v670_v60 = vsub.f32 %v1687_v42, %v628_v55 }
 0x362   :  { %v723_v29 = vmul.f32 1.442695, %v675_v33  ;;  %v725_v51 = vmul.f32 1.442695, %v676_v6  ;;  %1293 = vpow2.f32 %v727_v56  ;;  %v711_v45 = vmul.f32 1.442695, %v669_v8 }
 0x363   :  { %v631_v40 = vpop.xlane.xlu0 %630  ;;  %v622_v46 = vpop.xlane.xlu1 %621 }
 0x364   :  { %1295 = vpow2.f32 %v723_v29  ;;  %v671_v0 = vsub.f32 %v1720_v2, %v631_v40  ;;  %v672_v43 = vsub.f32 %v1708_v63, %v631_v40  ;;  %v665_v14 = vsub.f32 %v1716_v62, %v622_v46 }
 0x365   :  { %v1791_v10 = vpop.eup %1273  ;;  %1297 = vpow2.f32 %v725_v51 }
 0x366   :  { %v1793_v12 = vpop.eup %1275  ;;  %1299 = vpow2.f32 %v729_v37  ;;  %v715_v13 = vmul.f32 1.442695, %v671_v0  ;;  %v717_v16 = vmul.f32 1.442695, %v672_v43  ;;  %v703_v25 = vmul.f32 1.442695, %v665_v14 }
 0x367   :  { %v1795_v17 = vpop.eup %1277  ;;  %1301 = vpow2.f32 %v719_v49  ;;  %v625_v11 = vpop.xlane.xlu0 %624  ;;  %v797_v63 = vadd.f32 %v1793_v12, %v1791_v10 }
 0x368   :  { %v1800_v2 = vpop.eup %1279  ;;  %1303 = vpow2.f32 %v715_v13  ;;  %v667_v18 = vsub.f32 %v1740_v5, %v625_v11  ;;  %v668_v21 = vsub.f32 %v1728_v59, %v625_v11  ;;  %v713_v5 = vmul.f32 1.442695, %v670_v60  ;;  %v616_v30 = vpop.xlane.xlu1 %615 }
 0x369   :  { %v1804_v23 = vpop.eup %1281  ;;  %1305 = vpow2.f32 %v717_v16  ;;  %798 = vadd.xlane.f32.xlu0 %v797_v63  ;;  %v666_v59 = vsub.f32 %v1704_v57, %v622_v46  ;;  %v794_v57 = vadd.f32 %v1800_v2, %v1795_v17  ;;  %v661_v39 = vsub.f32 %v1736_v58, %v616_v30 }
 0x36a   :  { %v1808_v42 = vpop.eup %1283  ;;  %1307 = vpow2.f32 %v721_v36  ;;  %v707_v15 = vmul.f32 1.442695, %v667_v18  ;;  %v709_v28 = vmul.f32 1.442695, %v668_v21 }
 0x36b   :  { %v1811_v19 = vpop.eup %1285  ;;  %1309 = vpow2.f32 %v711_v45  ;;  %v619_v20 = vpop.xlane.xlu0 %618  ;;  %v800_v31 = vadd.f32 %v1808_v42, %v1804_v23  ;;  %v705_v61 = vmul.f32 1.442695, %v666_v59 }
 0x36c   :  { %v1816_v26 = vpop.eup %1287  ;;  %1311 = vpow2.f32 %v707_v15  ;;  %v663_v27 = vsub.f32 %v1752_v47, %v619_v20  ;;  %v664_v62 = vsub.f32 %v1744_v48, %v619_v20  ;;  %v662_v47 = vsub.f32 %v1724_v54, %v616_v30 }
 0x36d   :  { %v1820_v32 = vpop.eup %1289  ;;  %1313 = vpow2.f32 %v709_v28  ;;  %801 = vadd.xlane.f32.xlu1 %v800_v31  ;;  %792 = vadd.xlane.f32.xlu0 %v791_v24  ;;  %v695_v54 = vmul.f32 1.442695, %v661_v39 }
 0x36e   :  { %v1824_v38 = vpop.eup %1291  ;;  %v699_v44 = vmul.f32 1.442695, %v663_v27  ;;  %v701_v22 = vmul.f32 1.442695, %v664_v62  ;;  %1315 = vpow2.f32 %v713_v5  ;;  %v697_v6 = vmul.f32 1.442695, %v662_v47 }
 0x36f   :  { %v613_v48 = vpop.xlane.xlu0 %612  ;;  %v785_v34 = vadd.f32 %v1824_v38, %v1820_v32  ;;  %v1830_v35 = vpop.eup %1293 }
 0x370   :  { %1317 = vpow2.f32 %v699_v44  ;;  %v659_v1 = vsub.f32 %v1762_v7, %v613_v48  ;;  %v660_v56 = vsub.f32 %v1756_v50, %v613_v48  ;;  %v788_v50 = vadd.f32 %v1816_v26, %v1811_v19 }
 0x371   :  { %v1834_v3 = vpop.eup %1295  ;;  %1319 = vpow2.f32 %v701_v22  ;;  %786 = vadd.xlane.f32.xlu0 %v785_v34  ;;  %795 = vadd.xlane.f32.xlu1 %v794_v57 }
 0x372   :  { %v1836_v58 = vpop.eup %1297  ;;  %1321 = vpow2.f32 %v703_v25  ;;  %v691_v53 = vmul.f32 1.442695, %v659_v1  ;;  %v693_v55 = vmul.f32 1.442695, %v660_v56 }
 0x373   :  { %v1838_v33 = vpop.eup %1299  ;;  %1323 = vpow2.f32 %v705_v61  ;;  %v779_v7 = vadd.f32 %v1836_v58, %v1834_v3 }
 0x374   :  { %v1844_v37 = vpop.eup %1301  ;;  %1325 = vpow2.f32 %v691_v53  ;;  %v782_v8 = vadd.f32 %v1838_v33, %v1830_v35 }
 0x375   :  { %v1846_v52 = vpop.eup %1303  ;;  %1327 = vpow2.f32 %v693_v55  ;;  %780 = vadd.xlane.f32.xlu0 %v779_v7  ;;  %789 = vadd.xlane.f32.xlu1 %v788_v50 }
 0x376   :  { %v1848_v29 = vpop.eup %1305  ;;  %1329 = vpow2.f32 %v695_v54 }
 0x377   :  { %v1850_v51 = vpop.eup %1307  ;;  %1331 = vpow2.f32 %v697_v6  ;;  %v773_v49 = vadd.f32 %v1848_v29, %v1846_v52 }
 0x378   :  { %v1856_v40 = vpop.eup %1309  ;;  %v776_v36 = vadd.f32 %v1850_v51, %v1844_v37 }
 0x379   :  { %v1858_v0 = vpop.eup %1311  ;;  %774 = vadd.xlane.f32.xlu0 %v773_v49  ;;  %783 = vadd.xlane.f32.xlu1 %v782_v8 }
 0x37a   :  { %v1860_v43 = vpop.eup %1313 }
 0x37b   :  { %v767_v46 = vadd.f32 %v1860_v43, %v1858_v0  ;;  %v1866_v13 = vpop.eup %1315 }
 0x37c   :  { %v770_v63 = vadd.f32 %v1866_v13, %v1856_v40 }
 0x37d   :  { %v1868_v16 = vpop.eup %1317  ;;  %768 = vadd.xlane.f32.xlu0 %v767_v46  ;;  %777 = vadd.xlane.f32.xlu1 %v776_v36 }
 0x37e   :  { %v1870_v60 = vpop.eup %1319 }
 0x37f   :  { %v1872_v45 = vpop.eup %1321  ;;  %v761_v11 = vadd.f32 %v1870_v60, %v1868_v16 }
 0x380   :  { %v1878_v18 = vpop.eup %1323 }
 0x381   :  { %v1880_v21 = vpop.eup %1325  ;;  %762 = vadd.xlane.f32.xlu0 %v761_v11  ;;  %771 = vadd.xlane.f32.xlu1 %v770_v63  ;;  %v764_v28 = vadd.f32 %v1878_v18, %v1872_v45 }
 0x382   :  { %v1882_v24 = vpop.eup %1327 }
 0x383   :  { %v1884_v14 = vpop.eup %1329  ;;  %v755_v15 = vadd.f32 %v1882_v24, %v1880_v21 }
 0x384   :  { %v1890_v5 = vpop.eup %1331 }
 0x385   :  { %756 = vadd.xlane.f32.xlu0 %v755_v15  ;;  %765 = vadd.xlane.f32.xlu1 %v764_v28  ;;  %v758_v59 = vadd.f32 %v1890_v5, %v1884_v14 }
 0x389   :  { %759 = vadd.xlane.f32.xlu1 %v758_v59 }
 0x3f2   :  { %v799_v30 = vpop.xlane.xlu0 %798 }
 0x3f3   :  { %1333 = vrcp.f32 %v799_v30 }
 0x3f6   :  { %v793_v20 = vpop.xlane.xlu0 %792  ;;  %v802_v31 = vpop.xlane.xlu1 %801 }
 0x3f7   :  { %1335 = vrcp.f32 %v793_v20 }
 0x3f8   :  { %1337 = vrcp.f32 %v802_v31 }
 0x3fa   :  { %v787_v27 = vpop.xlane.xlu0 %786  ;;  %v796_v62 = vpop.xlane.xlu1 %795 }
 0x3fb   :  { %1339 = vrcp.f32 %v787_v27 }
 0x3fc   :  { %1341 = vrcp.f32 %v796_v62 }
 0x3fe   :  { %v781_v57 = vpop.xlane.xlu0 %780  ;;  %v790_v25 = vpop.xlane.xlu1 %789 }
 0x3ff   :  { %1343 = vrcp.f32 %v781_v57 }
 0x400   :  { %v1334_v39 = vpop.eup %1333  ;;  %1345 = vrcp.f32 %v790_v25 }
 0x401   :  { %v833_v44 = vmul.f32 %v1334_v39, %v799_v30 }
 0x402   :  { %v775_v22 = vpop.xlane.xlu0 %774  ;;  %v784_v61 = vpop.xlane.xlu1 %783 }
 0x403   :  { %v849_v47 = vsub.f32 2.0, %v833_v44  ;;  %1347 = vrcp.f32 %v775_v22 }
 0x404   :  { %v1336_v48 = vpop.eup %1335  ;;  %1349 = vrcp.f32 %v784_v61 }
 0x405   :  { %v1338_v34 = vpop.eup %1337  ;;  %v831_v1 = vmul.f32 %v1336_v48, %v793_v20  ;;  %v865_v55 = vmul.f32 %v1334_v39, %v849_v47 }
 0x406   :  { %v834_v56 = vmul.f32 %v1338_v34, %v802_v31  ;;  %v769_v54 = vpop.xlane.xlu0 %768  ;;  %v1894_v53 = vpop.xlane.xlu1 %777 }
 0x407   :  { %v847_v6 = vsub.f32 2.0, %v831_v1  ;;  %1351 = vrcp.f32 %v769_v54  ;;  %v895_v28 = vmul.f32 %v1791_v10, %v865_v55  ;;  %v896_v30 = vmul.f32 %v1793_v12, %v865_v55 }
 0x408   :  { %v1340_v7 = vpop.eup %1339  ;;  %v850_v50 = vsub.f32 2.0, %v834_v56  ;;  %1353 = vrcp.f32 %v1894_v53 }
 0x409   :  { %v1342_v49 = vpop.eup %1341  ;;  %v863_v8 = vmul.f32 %v1336_v48, %v847_v6  ;;  %v829_v46 = vmul.f32 %v1340_v7, %v787_v27 }
 0x40a   :  { %v866_v36 = vmul.f32 %v1338_v34, %v850_v50  ;;  %v832_v11 = vmul.f32 %v1342_v49, %v796_v62  ;;  %v1897_v63 = vpop.xlane.xlu0 %762  ;;  %v1899_v15 = vpop.xlane.xlu1 %771 }
 0x40b   :  { %v845_v59 = vsub.f32 2.0, %v829_v46  ;;  %1355 = vrcp.f32 %v1897_v63  ;;  %v891_v44 = vmul.f32 %v1783_v41, %v863_v8 }
 0x40c   :  { %v1344_v20 = vpop.eup %1343  ;;  %v897_v31 = vmul.f32 %v1804_v23, %v866_v36  ;;  %v848_v39 = vsub.f32 2.0, %v832_v11  ;;  %1357 = vrcp.f32 %v1899_v15  ;;  %v898_v27 = vmul.f32 %v1808_v42, %v866_v36 }
 0x40d   :  { %v1346_v62 = vpop.eup %1345  ;;  %v827_v47 = vmul.f32 %v1344_v20, %v781_v57  ;;  %v861_v55 = vmul.f32 %v1340_v7, %v845_v59  ;;  %v892_v23 = vmul.f32 %v1787_v9, %v863_v8 }
 0x40e   :  { %v864_v48 = vmul.f32 %v1342_v49, %v848_v39  ;;  %v830_v34 = vmul.f32 %v1346_v62, %v790_v25  ;;  %v1908_v10 = vpop.xlane.xlu0 %756  ;;  %v1910_v1 = vpop.xlane.xlu1 %765  ;;  %v989_v56 = vpack.c.bf16 %v898_v27, %v896_v30  ;;  %v988_v12 = vpack.c.bf16 %v897_v31, %v895_v28 }
 0x40f   :  { %v843_v6 = vsub.f32 2.0, %v827_v47  ;;  %1359 = vrcp.f32 %v1908_v10  ;;  %v887_v59 = vmul.f32 %v1820_v32, %v861_v55 }
 0x410   :  { %v1348_v50 = vpop.eup %1347  ;;  %v893_v42 = vmul.f32 %v1795_v17, %v864_v48  ;;  %v846_v46 = vsub.f32 2.0, %v830_v34  ;;  %1361 = vrcp.f32 %v1910_v1  ;;  %990 = vmatprep.subr.bf16.mxu0 %v989_v56  ;;  %v894_v41 = vmul.f32 %v1800_v2, %v864_v48 }
 0x411   :  { %v1350_v57 = vpop.eup %1349  ;;  %v825_v25 = vmul.f32 %v1348_v50, %v775_v22  ;;  %991 = vmatpush1.bf16.msra.mxu0 %v988_v12  ;;  %v859_v9 = vmul.f32 %v1344_v20, %v843_v6  ;;  %v888_v2 = vmul.f32 %v1824_v38, %v861_v55 }
 0x412   :  { %v862_v49 = vmul.f32 %v1346_v62, %v846_v46  ;;  %v828_v36 = vmul.f32 %v1350_v57, %v784_v61  ;;  %v760_v7 = vpop.xlane.xlu1 %759  ;;  %v987_v11 = vpack.c.bf16 %v894_v41, %v892_v23  ;;  %v986_v28 = vpack.c.bf16 %v893_v42, %v891_v44 }
 0x413   :  { %v841_v8 = vsub.f32 2.0, %v825_v25  ;;  %1363 = vrcp.f32 %v760_v7  ;;  %v883_v20 = vmul.f32 %v1834_v3, %v859_v9  ;;  %v884_v38 = vmul.f32 %v1836_v58, %v859_v9 }
 0x414   :  { %v1352_v17 = vpop.eup %1351  ;;  %v889_v30 = vmul.f32 %v1811_v19, %v862_v49  ;;  %v844_v31 = vsub.f32 2.0, %v828_v36  ;;  %992 = vmatprep.subr.bf16.mxu0 %v987_v11  ;;  %v890_v22 = vmul.f32 %v1816_v26, %v862_v49 }
 0x415   :  { %v1354_v39 = vpop.eup %1353  ;;  %v823_v27 = vmul.f32 %v1352_v17, %v769_v54  ;;  %993 = vmatpush1.bf16.msra.mxu0 %v986_v28  ;;  %v857_v47 = vmul.f32 %v1348_v50, %v841_v8 }
 0x416   :  { %v860_v61 = vmul.f32 %v1350_v57, %v844_v31  ;;  %v826_v62 = vmul.f32 %v1354_v39, %v1894_v53  ;;  %v985_v44 = vpack.c.bf16 %v890_v22, %v888_v2  ;;  %v984_v32 = vpack.c.bf16 %v889_v30, %v887_v59 }
 0x417   :  { %v839_v48 = vsub.f32 2.0, %v823_v27  ;;  %v879_v23 = vmul.f32 %v1846_v52, %v857_v47 }
 0x418   :  { %v1356_v34 = vpop.eup %1355  ;;  %v885_v19 = vmul.f32 %v1830_v35, %v860_v61  ;;  %v842_v56 = vsub.f32 2.0, %v826_v62  ;;  %994 = vmatprep.subr.bf16.mxu0 %v985_v44  ;;  %v886_v26 = vmul.f32 %v1838_v33, %v860_v61  ;;  %v880_v35 = vmul.f32 %v1848_v29, %v857_v47 }
 0x419   :  { %v1358_v54 = vpop.eup %1357  ;;  %v821_v12 = vmul.f32 %v1356_v34, %v1897_v63  ;;  %995 = vmatpush1.bf16.msra.mxu0 %v984_v32  ;;  %v855_v50 = vmul.f32 %v1352_v17, %v839_v48 }
 0x41a   :  { %v858_v53 = vmul.f32 %v1354_v39, %v842_v56  ;;  %v824_v55 = vmul.f32 %v1358_v54, %v1899_v15  ;;  %v983_v6 = vpack.c.bf16 %v886_v26, %v884_v38  ;;  %v982_v3 = vpack.c.bf16 %v885_v19, %v883_v20 }
 0x41b   :  { %v837_v58 = vsub.f32 2.0, %v821_v12  ;;  %v875_v36 = vmul.f32 %v1858_v0, %v855_v50  ;;  %v876_v11 = vmul.f32 %v1860_v43, %v855_v50 }
 0x41c   :  { %v1360_v42 = vpop.eup %1359  ;;  %v881_v46 = vmul.f32 %v1844_v37, %v858_v53  ;;  %v840_v41 = vsub.f32 2.0, %v824_v55  ;;  %996 = vmatprep.subr.bf16.mxu0 %v983_v6  ;;  %v882_v33 = vmul.f32 %v1850_v51, %v858_v53 }
 0x41d   :  { %v1362_v63 = vpop.eup %1361  ;;  %v819_v57 = vmul.f32 %v1360_v42, %v1908_v10  ;;  %997 = vmatpush1.bf16.msra.mxu0 %v982_v3  ;;  %v853_v28 = vmul.f32 %v1356_v34, %v837_v58 }
 0x41e   :  { %v856_v15 = vmul.f32 %v1358_v54, %v840_v41  ;;  %v822_v25 = vmul.f32 %v1362_v63, %v1910_v1  ;;  %v981_v49 = vpack.c.bf16 %v882_v33, %v880_v35  ;;  %v980_v52 = vpack.c.bf16 %v881_v46, %v879_v23 }
 0x41f   :  { %v835_v29 = vsub.f32 2.0, %v819_v57  ;;  %v871_v0 = vmul.f32 %v1868_v16, %v853_v28  ;;  %v872_v43 = vmul.f32 %v1870_v60, %v853_v28  ;;  %v973_v60 = vld [vmem:[%s1965_s6] sm:$0x1] }
 0x420   :  { %v1364_v37 = vpop.eup %1363  ;;  %v877_v59 = vmul.f32 %v1856_v40, %v856_v15  ;;  %v838_v9 = vsub.f32 2.0, %v822_v25  ;;  %998 = vmatprep.subr.bf16.mxu0 %v981_v49  ;;  %v878_v51 = vmul.f32 %v1866_v13, %v856_v15 }
 0x421   :  { %v820_v10 = vmul.f32 %v1364_v37, %v760_v7  ;;  %999 = vmatpush1.bf16.msra.mxu0 %v980_v52  ;;  %v851_v30 = vmul.f32 %v1360_v42, %v835_v29 }
 0x422   :  { %v854_v8 = vmul.f32 %v1362_v63, %v838_v9  ;;  %v979_v17 = vpack.c.bf16 %v878_v51, %v876_v11  ;;  %v978_v1 = vpack.c.bf16 %v877_v59, %v875_v36 }
 0x423   :  { %v836_v31 = vsub.f32 2.0, %v820_v10  ;;  %v867_v7 = vmul.f32 %v1880_v21, %v851_v30  ;;  %v868_v27 = vmul.f32 %v1882_v24, %v851_v30 }
 0x424   :  { %v873_v2 = vmul.f32 %v1872_v45, %v854_v8  ;;  %1000 = vmatprep.subr.bf16.mxu0 %v979_v17  ;;  %v874_v40 = vmul.f32 %v1878_v18, %v854_v8  ;;  %v38_v18 = vld [vmem:[%s1966_s7] sm:$0xf] }
 0x425   :  { %v852_v22 = vmul.f32 %v1364_v37, %v836_v31  ;;  %1001 = vmatpush1.bf16.msra.mxu0 %v978_v1  ;;  %39 = vst [vmem:[#allocation4] sm:$0xf] %v38_v18 }
 0x426   :  { %v977_v39 = vpack.c.bf16 %v874_v40, %v872_v43  ;;  %v976_v13 = vpack.c.bf16 %v873_v2, %v871_v0 }
 0x427   :  { %v869_v61 = vmul.f32 %v1884_v14, %v852_v22  ;;  %v870_v62 = vmul.f32 %v1890_v5, %v852_v22 }
 0x428   :  { %1002 = vmatprep.subr.bf16.mxu0 %v977_v39 }
 0x429   :  { %v974_v16 = vpack.c.bf16 %v869_v61, %v867_v7  ;;  %1003 = vmatpush1.bf16.msra.mxu0 %v976_v13  ;;  %v975_v45 = vpack.c.bf16 %v870_v62, %v868_v27 }
 0x42b   :  { %1004 = vmatprep.subr.bf16.mxu0 %v975_v45 }
 0x42d   :  { %1005 = vmatpush1.bf16.msra.mxu0 %v974_v16 }
 0x430   :  { %1023 = vmatmul.mubr.bf16.vlgmr.msra.gmra.mxu0 %v973_v60 }
 0x431   :  { %1376 = shalt.err (!%p1373_p4)
}
 0x432   :  { %s1411_s29 = smov 64   ;;  %s1412_s30 = smov 4   ;;  %v1413_v21 = vmov 1983009808   ;;  %v972_v48 = vld [vmem:[#allocation4] sm:$0xf] }
 0x433   :  { %1055 = dma.vmem_to_hbm [thread:$0]  %s1050_s27, 1024, %s1967_s8, [#allocation3], %s1411_s29, %s1411_s29, %s1412_s30   ;;  %v1035_v24 = vunpack.c.l.s4 %v1413_v21 }
 0x434   :  { %s1414_s7 = smov [#allocation4]  }
 0x435   :  { %v1036_v14 = vunpack.c.0.s8 %v1035_v24  ;;  %s1062_s10 = sshll.u32 %s1414_s7, 4  ;;  %s1063_s10 = int_to_ptr.vmem [resolvable:$true] %s1062_s10 }
 0x436   :  { %s1385_s11 = scalar_lea.vmem %s1063_s10, 64  ;;  %p1390_p6 = scmp.lt.s32.totalorder %s1063_s10, %s1063_s10 }
 0x437   :  { %v1039_v44 = vsub.s32 %v1036_v14, %v1615_v4  ;;  %p1386_p5 = scmp.ne.s32.totalorder %s1063_s10, %s1385_s11  ;;  %p1391_p7 = scmp.lt.s32.totalorder %s1385_s11, %s1385_s11 }
 0x439   :  { %p1392_p8 = por %p1391_p7, %p1390_p6 }
 0x43b   :  { %p1393_p9 = pnand %p1392_p8, %p1386_p5 }
 0x4f0   :  { %v1024_v5 = vpop.f32.mrf.mxu0 }
 0x4f2   :  { %v1026_v32 = vpop.f32.mrf.mxu0 }
 0x4f3   :  { %v1033_v20 = vcombine.low %v1024_v5, %v1026_v32 }
 0x4f4   :  { %v1028_v47 = vpop.f32.mrf.mxu0 }
 0x4f5   :  { %v1040_v34 = vrot.slane %v1033_v20, %v1039_v44 }
 0x4f6   :  { %v1029_v19 = vpop.f32.mrf.mxu0 }
 0x4f7   :  { %v1042_v56 = vadd.f32 %v1040_v34, %v972_v48 }
 0x4f9   :  { %1043 = vst [vmem:[#allocation4] sm:$0xf] %v1042_v56 }
 0x4fa   :  { %1396 = shalt.err (!%p1393_p9)
}
 0x4fb   :  { %1065 = dma.vmem_to_hbm [thread:$0]  %s1063_s10, 64, %s1968_s9, [#allocation5]  }
 0x4fc   :  { %1405 = dma.done.wait [#allocation3], 1024  }
 0x4fd   :  { %1406 = vsyncadd [#allocation3], 4294966272 }
 0x4fe   :  { %1407 = dma.done.wait [#allocation5], 64  }
 0x4ff   :  { %1408 = vsyncadd [#allocation5], 4294967232 }
 0x500   :  { %1072 = vsyncpa [#allocation3], 1 }
 0x501   :  { %1073 = vsyncpa [#allocation5], 1 }

// kernel: neural_fp.2
= control target key start
LH: loop header
LB: loop body
LE: loop exit
PB: predicated region body
PF: predicated region fallthrough
CT: control target
= control target key end

     0   :  { %vm242_vm0 = vcmask 261120   ;;  %v1337_v50 = vmov 0   ;;  %vm953_vm1 = vcmask 257024   ;;  %s1934_s1 = inlined_call_operand.vmem [shape: bf16[128,32], index: 1, kind: input, shape index: {}]   ;;  %s1935_s0 = inlined_call_operand.vmem [shape: s8[128,128], index: 0, kind: input, shape index: {}]   ;;  %s1936_s2 = inlined_call_operand.vmem [shape: bf16[32,32], index: 2, kind: input, shape index: {}]   ;;  %s1937_s4 = inlined_call_operand.vmem [shape: bf16[32,256], index: 4, kind: input, shape index: {}]   ;;  %s1938_s3 = inlined_call_operand.vmem [shape: f32[1,32], index: 3, kind: input, shape index: {}]   ;;  %s1939_s8 = inlined_call_operand.vmem [shape: bf16[128,32], index: 8, kind: output, shape index: {0}]   ;;  %s1940_s5 = inlined_call_operand.vmem [shape: f32[1,256], index: 5, kind: input, shape index: {}]   ;;  %s1941_s6 = inlined_call_operand.vmem [shape: bf16[2,128], index: 6, kind: input, shape index: {}]   ;;  %s1942_s7 = inlined_call_operand.vmem [shape: f32[2,256], index: 7, kind: input, shape index: {}]   ;;  %s1943_s9 = inlined_call_operand.vmem [shape: f32[2,256], index: 9, kind: output, shape index: {1}]  }
   0x1   :  { %v1193_v0 = vld [vmem:[%s1934_s1 + $0x38] sm:$0xff]   ;;  %v1194_v1 = vld [vmem:[%s1934_s1 + $0x30] sm:$0xff]   ;;  %v1195_v2 = vld [vmem:[%s1934_s1 + $0x28] sm:$0xff]  }
   0x2   :  { %1139 = vmatprep.subr.bf16.mxu0 %v1193_v0  ;;  %v1196_v3 = vld [vmem:[%s1934_s1 + $0x20] sm:$0xff]   ;;  %v1197_v6 = vld [vmem:[%s1934_s1 + $0x18] sm:$0xff]   ;;  %v1198_v7 = vld [vmem:[%s1934_s1 + $0x10] sm:$0xff]  }
   0x3   :  { %1140 = vmatpush3.bf16.msra.mxu0 %v1193_v0  ;;  %v38_v4 = vld [vmem:[%s1935_s0] sm:$0xff]  ;;  %v1199_v8 = vld [vmem:[%s1934_s1 + $0x8] sm:$0xff]   ;;  %v40_v13 = vld [vmem:[%s1935_s0 + $0x10] sm:$0xff] }
   0x4   :  { %1141 = vmatprep.subr.bf16.mxu0 %v1194_v1  ;;  %v42_v5 = vunpack.c.l.s8.bf16 %v38_v4  ;;  %v1200_v9 = vld [vmem:[%s1934_s1] sm:$0xff]   ;;  %v39_v10 = vld [vmem:[%s1935_s0 + $0x8] sm:$0xff]  ;;  %v43_v11 = vunpack.c.h.s8.bf16 %v38_v4  ;;  %v46_v15 = vunpack.c.l.s8.bf16 %v40_v13  ;;  %v41_v16 = vld [vmem:[%s1935_s0 + $0x18] sm:$0xff]  ;;  %v47_v17 = vunpack.c.h.s8.bf16 %v40_v13 }
   0x5   :  { %v44_v12 = vunpack.c.l.s8.bf16 %v39_v10  ;;  %v45_v14 = vunpack.c.h.s8.bf16 %v39_v10  ;;  %v48_v18 = vunpack.c.l.s8.bf16 %v41_v16  ;;  %v49_v19 = vunpack.c.h.s8.bf16 %v41_v16  ;;  %v1201_v20 = vld [vmem:[%s1936_s2 + $0x8] sm:$0xff]   ;;  %v1202_v21 = vld [vmem:[%s1936_s2] sm:$0xff]   ;;  %v1205_v22 = vld [vmem:[%s1937_s4 + $0x14] ss:$8 sps:$4 sm:$0xff]  }
   0x6   :  { %1155 = vmatprep.mubr.bf16.mxu0 %v42_v5  ;;  %1171 = vmatprep.subr.bf16.mxu1 %v1201_v20  ;;  %v1203_v28 = vld [vmem:[%s1937_s4 + $0x10] ss:$8 sps:$4 sm:$0xff]   ;;  %v1208_v48 = vld [vmem:[%s1937_s4 + $0x4] ss:$8 sps:$4 sm:$0xff]   ;;  %v1206_v49 = vld [vmem:[%s1937_s4] ss:$8 sps:$4 sm:$0xff]  }
   0x7   :  { %1142 = vmatpush3.bf16.msra.mxu0 %v1194_v1  ;;  %1172 = vmatpush3.bf16.msra.mxu1 %v1201_v20  ;;  %v1456_v51 = vld [vmem:[%s1938_s3] ss:$0 sm:$0xff] }
   0x8   :  { %1143 = vmatprep.subr.bf16.mxu0 %v1195_v2  ;;  %1173 = vmatprep.subr.bf16.mxu1 %v1202_v21 }
   0xb   :  { %1144 = vmatpush3.bf16.msra.mxu0 %v1195_v2  ;;  %1174 = vmatpush3.bf16.msra.mxu1 %v1202_v21 }
   0xc   :  { %1145 = vmatprep.subr.bf16.mxu0 %v1196_v3  ;;  %508 = vmatprep.subr.bf16.mxu1 %v1205_v22 }
   0xf   :  { %1146 = vmatpush3.bf16.msra.mxu0 %v1196_v3 }
  0x10   :  { %1147 = vmatprep.subr.bf16.mxu0 %v1197_v6 }
  0x13   :  { %1148 = vmatpush3.bf16.msra.mxu0 %v1197_v6 }
  0x14   :  { %1149 = vmatprep.subr.bf16.mxu0 %v1198_v7 }
  0x17   :  { %1150 = vmatpush3.bf16.msra.mxu0 %v1198_v7 }
  0x18   :  { %1151 = vmatprep.subr.bf16.mxu0 %v1199_v8 }
  0x1b   :  { %1152 = vmatpush3.bf16.msra.mxu0 %v1199_v8 }
  0x1c   :  { %1153 = vmatprep.subr.bf16.mxu0 %v1200_v9 }
  0x1f   :  { %1154 = vmatpush3.bf16.msra.mxu0 %v1200_v9 }
  0x22   :  { %1156 = vmatmul.mubr.bf16.vlgmr.msra.gmra.mxu0 %v43_v11 }
  0x23   :  { %1159 = vmatprep.mubr.bf16.mxu0 %v44_v12 }
  0x2a   :  { %1160 = vmatmul.mubr.bf16.gmra.mxu0 %v45_v14 }
  0x2b   :  { %1163 = vmatprep.mubr.bf16.mxu0 %v46_v15 }
  0x32   :  { %1164 = vmatmul.mubr.bf16.gmra.mxu0 %v47_v17 }
  0x33   :  { %1167 = vmatprep.mubr.bf16.mxu0 %v48_v18 }
  0x3a   :  { %1168 = vmatmul.mubr.bf16.gmra.mxu0 %v49_v19 }
  0x3b   :  { %1020 = vmatprep.mubr.bf16.mxu0 %v1337_v50 }
  0xe2   :  { %v1157_v23 = vpop.f32.mrf.mxu0 }
  0xe4   :  { %v148_v24 = vpop.f32.mrf.mxu0 }
  0xe6   :  { %v1158_v25 = vpop.f32.mrf.mxu0 }
  0xe7   :  { %v212_v29 = vpack.c.bf16 %v1158_v25, %v1157_v23 }
  0xe8   :  { %v151_v26 = vpop.f32.mrf.mxu0 }
  0xe9   :  { %v211_v27 = vpack.c.bf16 %v151_v26, %v148_v24 }
  0xea   :  { %v1161_v30 = vpop.f32.mrf.mxu0 }
  0xeb   :  { %1175 = vmatprep.mubr.msk.bf16.mxu1 %vm242_vm0, %v211_v27 }
  0xec   :  { %v164_v31 = vpop.f32.mrf.mxu0  ;;  %1176 = vmatmul.mubr.msk.bf16.vlgmr.msra.gmra.mxu1 %vm242_vm0, %v212_v29 }
  0xed   :  { %509 = vmatpush1.bf16.msra.mxu1 %v1203_v28 }
  0xee   :  { %v1162_v32 = vpop.f32.mrf.mxu0  ;;  %510 = vmatprep.subr.bf16.mxu1 %v1208_v48 }
  0xef   :  { %v214_v33 = vpack.c.bf16 %v1162_v32, %v1161_v30 }
  0xf0   :  { %v167_v34 = vpop.f32.mrf.mxu0 }
  0xf1   :  { %v213_v35 = vpack.c.bf16 %v167_v34, %v164_v31  ;;  %511 = vmatpush1.bf16.msra.mxu1 %v1206_v49 }
  0xf2   :  { %v1165_v36 = vpop.f32.mrf.mxu0 }
  0xf3   :  { %1179 = vmatprep.mubr.msk.bf16.mxu1 %vm242_vm0, %v213_v35 }
  0xf4   :  { %1180 = vmatmul.mubr.msk.bf16.gmra.mxu1 %vm242_vm0, %v214_v33  ;;  %v180_v37 = vpop.f32.mrf.mxu0 }
  0xf6   :  { %v1166_v38 = vpop.f32.mrf.mxu0 }
  0xf7   :  { %v216_v39 = vpack.c.bf16 %v1166_v38, %v1165_v36 }
  0xf8   :  { %v183_v40 = vpop.f32.mrf.mxu0 }
  0xf9   :  { %v215_v41 = vpack.c.bf16 %v183_v40, %v180_v37 }
  0xfa   :  { %v1169_v42 = vpop.f32.mrf.mxu0 }
  0xfb   :  { %1183 = vmatprep.mubr.msk.bf16.mxu1 %vm242_vm0, %v215_v41 }
  0xfc   :  { %1184 = vmatmul.mubr.msk.bf16.gmra.mxu1 %vm242_vm0, %v216_v39  ;;  %v196_v43 = vpop.f32.mrf.mxu0 }
  0xfe   :  { %v1170_v44 = vpop.f32.mrf.mxu0 }
  0xff   :  { %v218_v45 = vpack.c.bf16 %v1170_v44, %v1169_v42 }
 0x100   :  { %v199_v46 = vpop.f32.mrf.mxu0 }
 0x101   :  { %v217_v47 = vpack.c.bf16 %v199_v46, %v196_v43 }
 0x103   :  { %1187 = vmatprep.mubr.msk.bf16.mxu1 %vm242_vm0, %v217_v47 }
 0x104   :  { %1188 = vmatmul.mubr.msk.bf16.gmra.mxu1 %vm242_vm0, %v218_v45 }
 0x105   :  { %528 = vmatprep.mubr.bf16.mxu1 %v1337_v50 }
 0x1ac   :  { %v1177_v52 = vpop.f32.mrf.mxu1 }
 0x1ad   :  { %v310_v53 = vadd.f32 %v1177_v52, %v1456_v51 }
 0x1ae   :  { %v301_v54 = vpop.f32.mrf.mxu1 }
 0x1af   :  { %v366_v55 = vmul.f32 0.5, %v310_v53  ;;  %v302_v56 = vadd.f32 %v1456_v51, %v301_v54 }
 0x1b0   :  { %v1178_v57 = vpop.f32.mrf.mxu1 }
 0x1b1   :  { %1209 = vtanh.f32 %v366_v55  ;;  %v364_v58 = vmul.f32 0.5, %v302_v56  ;;  %v313_v59 = vadd.f32 %v1178_v57, %v1456_v51 }
 0x1b2   :  { %v304_v60 = vpop.f32.mrf.mxu1 }
 0x1b3   :  { %1211 = vtanh.f32 %v364_v58  ;;  %v367_v61 = vmul.f32 0.5, %v313_v59  ;;  %v305_v62 = vadd.f32 %v1456_v51, %v304_v60 }
 0x1b4   :  { %v1181_v63 = vpop.f32.mrf.mxu1 }
 0x1b5   :  { %1213 = vtanh.f32 %v367_v61  ;;  %v365_v0 = vmul.f32 0.5, %v305_v62  ;;  %v326_v1 = vadd.f32 %v1181_v63, %v1456_v51 }
 0x1b6   :  { %v317_v2 = vpop.f32.mrf.mxu1 }
 0x1b7   :  { %1215 = vtanh.f32 %v365_v0  ;;  %v370_v3 = vmul.f32 0.5, %v326_v1  ;;  %v318_v4 = vadd.f32 %v1456_v51, %v317_v2 }
 0x1b8   :  { %v1182_v5 = vpop.f32.mrf.mxu1 }
 0x1b9   :  { %1217 = vtanh.f32 %v370_v3  ;;  %v368_v6 = vmul.f32 0.5, %v318_v4  ;;  %v329_v7 = vadd.f32 %v1182_v5, %v1456_v51 }
 0x1ba   :  { %v320_v8 = vpop.f32.mrf.mxu1 }
 0x1bb   :  { %1219 = vtanh.f32 %v368_v6  ;;  %v371_v9 = vmul.f32 0.5, %v329_v7  ;;  %v321_v10 = vadd.f32 %v1456_v51, %v320_v8 }
 0x1bc   :  { %v1185_v11 = vpop.f32.mrf.mxu1 }
 0x1bd   :  { %1221 = vtanh.f32 %v371_v9  ;;  %v369_v12 = vmul.f32 0.5, %v321_v10  ;;  %v342_v13 = vadd.f32 %v1185_v11, %v1456_v51 }
 0x1be   :  { %v1210_v14 = vpop.eup %1209  ;;  %v333_v15 = vpop.f32.mrf.mxu1 }
 0x1bf   :  { %v398_v16 = vadd.f32 1.0, %v1210_v14  ;;  %1223 = vtanh.f32 %v369_v12  ;;  %v374_v17 = vmul.f32 0.5, %v342_v13  ;;  %v334_v18 = vadd.f32 %v1456_v51, %v333_v15 }
 0x1c0   :  { %v1212_v19 = vpop.eup %1211  ;;  %v1186_v20 = vpop.f32.mrf.mxu1 }
 0x1c1   :  { %v1468_v21 = vmul.f32 0.5, %v398_v16  ;;  %v396_v22 = vadd.f32 1.0, %v1212_v19  ;;  %1225 = vtanh.f32 %v374_v17  ;;  %v372_v23 = vmul.f32 0.5, %v334_v18 }
 0x1c2   :  { %v1214_v24 = vpop.eup %1213  ;;  %v345_v25 = vadd.f32 %v1186_v20, %v1456_v51  ;;  %v336_v26 = vpop.f32.mrf.mxu1 }
 0x1c3   :  { %v1099_v27 = vpack.c.bf16 %v1468_v21, %v1468_v21  ;;  %v412_v28 = vmul.f32 0.5, %v396_v22  ;;  %v399_v29 = vadd.f32 1.0, %v1214_v24  ;;  %1227 = vtanh.f32 %v372_v23 }
 0x1c4   :  { %v1216_v30 = vpop.eup %1215  ;;  %v375_v31 = vmul.f32 0.5, %v345_v25  ;;  %v337_v32 = vadd.f32 %v1456_v51, %v336_v26  ;;  %v1189_v33 = vpop.f32.mrf.mxu1 }
 0x1c5   :  { %956 = vst.msk [vmem:[%s1939_s8 + $0x8] sm:$0xf] %vm953_vm1, %v1099_v27  ;;  %v1097_v34 = vpack.c.bf16 %v412_v28, %v412_v28  ;;  %v415_v35 = vmul.f32 0.5, %v399_v29  ;;  %v397_v36 = vadd.f32 1.0, %v1216_v30  ;;  %v358_v37 = vadd.f32 %v1189_v33, %v1456_v51 }
 0x1c6   :  { %v1218_v38 = vpop.eup %1217  ;;  %1229 = vtanh.f32 %v375_v31  ;;  %v373_v39 = vmul.f32 0.5, %v337_v32  ;;  %v349_v40 = vpop.f32.mrf.mxu1 }
 0x1c7   :  { %954 = vst.msk [vmem:[%s1939_s8] sm:$0xf] %vm953_vm1, %v1097_v34  ;;  %v1100_v41 = vpack.c.bf16 %v415_v35, %v415_v35  ;;  %v413_v42 = vmul.f32 0.5, %v397_v36  ;;  %v402_v43 = vadd.f32 1.0, %v1218_v38  ;;  %v378_v44 = vmul.f32 0.5, %v358_v37 }
 0x1c8   :  { %v1220_v45 = vpop.eup %1219  ;;  %1231 = vtanh.f32 %v373_v39  ;;  %v350_v46 = vadd.f32 %v1456_v51, %v349_v40  ;;  %v1190_v47 = vpop.f32.mrf.mxu1  ;;  %v429_v11 = vpack.c.bf16 %v415_v35, %v1468_v21 }
 0x1c9   :  { %957 = vst.msk [vmem:[%s1939_s8 + $0xc] sm:$0xf] %vm953_vm1, %v1100_v41  ;;  %v428_v48 = vpack.c.bf16 %v413_v42, %v412_v28  ;;  %v1098_v49 = vpack.c.bf16 %v413_v42, %v413_v42  ;;  %v1488_v52 = vmul.f32 0.5, %v402_v43  ;;  %v400_v53 = vadd.f32 1.0, %v1220_v45 }
 0x1ca   :  { %v1222_v54 = vpop.eup %1221  ;;  %1233 = vtanh.f32 %v378_v44  ;;  %v376_v55 = vmul.f32 0.5, %v350_v46  ;;  %v361_v56 = vadd.f32 %v1190_v47, %v1456_v51  ;;  %v352_v57 = vpop.f32.mrf.mxu1 }
 0x1cb   :  { %955 = vst.msk [vmem:[%s1939_s8 + $0x4] sm:$0xf] %vm953_vm1, %v1098_v49  ;;  %v1103_v58 = vpack.c.bf16 %v1488_v52, %v1488_v52  ;;  %v416_v59 = vmul.f32 0.5, %v400_v53  ;;  %v403_v60 = vadd.f32 1.0, %v1222_v54  ;;  %1073 = vmatmul.mubr.msk.bf16.vlgmr.msra.gmra.mxu1 %vm242_vm0, %v428_v48  ;;  %v353_v61 = vadd.f32 %v1456_v51, %v352_v57 }
 0x1cc   :  { %v1224_v62 = vpop.eup %1223  ;;  %1235 = vtanh.f32 %v376_v55  ;;  %538 = vmatprep.mubr.bf16.mxu1 %v1337_v50  ;;  %v379_v63 = vmul.f32 0.5, %v361_v56 }
 0x1cd   :  { %960 = vst.msk [vmem:[%s1939_s8 + $0x18] sm:$0xf] %vm953_vm1, %v1103_v58  ;;  %v1101_v0 = vpack.c.bf16 %v416_v59, %v416_v59  ;;  %v419_v1 = vmul.f32 0.5, %v403_v60  ;;  %v401_v2 = vadd.f32 1.0, %v1224_v62  ;;  %v377_v3 = vmul.f32 0.5, %v353_v61 }
 0x1ce   :  { %v1226_v4 = vpop.eup %1225  ;;  %1237 = vtanh.f32 %v379_v63 }
 0x1cf   :  { %958 = vst.msk [vmem:[%s1939_s8 + $0x10] sm:$0xf] %vm953_vm1, %v1101_v0  ;;  %v1104_v51 = vpack.c.bf16 %v419_v1, %v419_v1  ;;  %v417_v5 = vmul.f32 0.5, %v401_v2  ;;  %v406_v6 = vadd.f32 1.0, %v1226_v4  ;;  %1239 = vtanh.f32 %v377_v3 }
 0x1d0   :  { %v1228_v7 = vpop.eup %1227  ;;  %v431_v40 = vpack.c.bf16 %v419_v1, %v1488_v52  ;;  %v442_v1 = vlaneseq }
 0x1d1   :  { %961 = vst.msk [vmem:[%s1939_s8 + $0x1c] sm:$0xf] %vm953_vm1, %v1104_v51  ;;  %v1102_v8 = vpack.c.bf16 %v417_v5, %v417_v5  ;;  %v422_v9 = vmul.f32 0.5, %v406_v6  ;;  %v404_v10 = vadd.f32 1.0, %v1228_v7  ;;  %v430_v25 = vpack.c.bf16 %v417_v5, %v416_v59 }
 0x1d2   :  { %v1587_v4 = vshrl.u32 %v442_v1, 7 }
 0x1d3   :  { %v1230_v12 = vpop.eup %1229  ;;  %959 = vst.msk [vmem:[%s1939_s8 + $0x14] sm:$0xf] %vm953_vm1, %v1102_v8  ;;  %v1107_v13 = vpack.c.bf16 %v422_v9, %v422_v9  ;;  %v420_v14 = vmul.f32 0.5, %v404_v10  ;;  %1074 = vmatmul.mubr.msk.bf16.gmra.mxu1 %vm242_vm0, %v429_v11  ;;  %v440_v8 = vld [vmem:[%s1940_s5] sm:$0x3] }
 0x1d4   :  { %v407_v15 = vadd.f32 1.0, %v1230_v12  ;;  %548 = vmatprep.mubr.bf16.mxu1 %v1337_v50  ;;  %v444_v6 = vsub.s32 0, %v1587_v4  ;;  %v448_v7 = vsub.s32 1, %v1587_v4 }
 0x1d5   :  { %v1232_v16 = vpop.eup %1231  ;;  %964 = vst.msk [vmem:[%s1939_s8 + $0x28] sm:$0xf] %vm953_vm1, %v1107_v13  ;;  %v1105_v17 = vpack.c.bf16 %v420_v14, %v420_v14 }
 0x1d6   :  { %v423_v18 = vmul.f32 0.5, %v407_v15  ;;  %v405_v19 = vadd.f32 1.0, %v1232_v16  ;;  %v1594_v11 = vrot.slane %v440_v8, %v444_v6  ;;  %v1596_v12 = vrot.slane %v440_v8, %v448_v7 }
 0x1d7   :  { %v1234_v20 = vpop.eup %1233  ;;  %962 = vst.msk [vmem:[%s1939_s8 + $0x20] sm:$0xf] %vm953_vm1, %v1105_v17 }
 0x1d8   :  { %v1108_v21 = vpack.c.bf16 %v423_v18, %v423_v18  ;;  %v421_v22 = vmul.f32 0.5, %v405_v19  ;;  %v410_v23 = vadd.f32 1.0, %v1234_v20  ;;  %v433_v42 = vpack.c.bf16 %v423_v18, %v422_v9 }
 0x1d9   :  { %v1236_v24 = vpop.eup %1235 }
 0x1da   :  { %965 = vst.msk [vmem:[%s1939_s8 + $0x2c] sm:$0xf] %vm953_vm1, %v1108_v21  ;;  %v1106_v26 = vpack.c.bf16 %v421_v22, %v421_v22  ;;  %v426_v27 = vmul.f32 0.5, %v410_v23  ;;  %v408_v28 = vadd.f32 1.0, %v1236_v24  ;;  %v432_v41 = vpack.c.bf16 %v421_v22, %v420_v14 }
 0x1db   :  { %v1238_v29 = vpop.eup %1237  ;;  %1075 = vmatmul.mubr.msk.bf16.gmra.mxu1 %vm242_vm0, %v430_v25 }
 0x1dc   :  { %v1240_v30 = vpop.eup %1239  ;;  %963 = vst.msk [vmem:[%s1939_s8 + $0x24] sm:$0xf] %vm953_vm1, %v1106_v26  ;;  %v1111_v31 = vpack.c.bf16 %v426_v27, %v426_v27  ;;  %v424_v32 = vmul.f32 0.5, %v408_v28  ;;  %v411_v33 = vadd.f32 1.0, %v1238_v29  ;;  %558 = vmatprep.mubr.bf16.mxu1 %v1337_v50 }
 0x1dd   :  { %v409_v34 = vadd.f32 1.0, %v1240_v30 }
 0x1de   :  { %968 = vst.msk [vmem:[%s1939_s8 + $0x38] sm:$0xf] %vm953_vm1, %v1111_v31  ;;  %v1109_v35 = vpack.c.bf16 %v424_v32, %v424_v32  ;;  %v427_v36 = vmul.f32 0.5, %v411_v33 }
 0x1df   :  { %v425_v37 = vmul.f32 0.5, %v409_v34 }
 0x1e0   :  { %966 = vst.msk [vmem:[%s1939_s8 + $0x30] sm:$0xf] %vm953_vm1, %v1109_v35  ;;  %v1112_v38 = vpack.c.bf16 %v427_v36, %v427_v36  ;;  %v435_v44 = vpack.c.bf16 %v427_v36, %v426_v27 }
 0x1e1   :  { %v1110_v39 = vpack.c.bf16 %v425_v37, %v425_v37  ;;  %v434_v43 = vpack.c.bf16 %v425_v37, %v424_v32 }
 0x1e2   :  { %969 = vst.msk [vmem:[%s1939_s8 + $0x3c] sm:$0xf] %vm953_vm1, %v1112_v38 }
 0x1e3   :  { %967 = vst.msk [vmem:[%s1939_s8 + $0x34] sm:$0xf] %vm953_vm1, %v1110_v39  ;;  %1076 = vmatmul.mubr.msk.bf16.gmra.mxu1 %vm242_vm0, %v431_v40 }
 0x1e4   :  { %568 = vmatprep.mubr.bf16.mxu1 %v1337_v50 }
 0x1eb   :  { %1077 = vmatmul.mubr.msk.bf16.gmra.mxu1 %vm242_vm0, %v432_v41 }
 0x1ec   :  { %578 = vmatprep.mubr.bf16.mxu1 %v1337_v50 }
 0x1f3   :  { %1078 = vmatmul.mubr.msk.bf16.gmra.mxu1 %vm242_vm0, %v433_v42 }
 0x1f4   :  { %588 = vmatprep.mubr.bf16.mxu1 %v1337_v50 }
 0x1fb   :  { %1079 = vmatmul.mubr.msk.bf16.gmra.mxu1 %vm242_vm0, %v434_v43 }
 0x1fc   :  { %598 = vmatprep.mubr.bf16.mxu1 %v1337_v50 }
 0x203   :  { %1080 = vmatmul.mubr.msk.bf16.gmra.mxu1 %vm242_vm0, %v435_v44 }
 0x28b   :  { %v1563_v45 = vpop.f32.mrf.mxu1 }
 0x28c   :  { %v1734_v6 = vadd.f32 %v1563_v45, %v1594_v11 }
 0x28d   :  { %v1565_v46 = vpop.f32.mrf.mxu1 }
 0x28f   :  { %v1567_v47 = vpop.f32.mrf.mxu1 }
 0x291   :  { %v1569_v48 = vpop.f32.mrf.mxu1 }
 0x293   :  { %v1571_v49 = vpop.f32.mrf.mxu1 }
 0x295   :  { %v1573_v52 = vpop.f32.mrf.mxu1 }
 0x297   :  { %v1575_v53 = vpop.f32.mrf.mxu1 }
 0x299   :  { %v1577_v54 = vpop.f32.mrf.mxu1 }
 0x29b   :  { %v1579_v50 = vpop.f32.mrf.mxu1 }
 0x29d   :  { %v1581_v55 = vpop.f32.mrf.mxu1 }
 0x29f   :  { %v554_v56 = vpop.f32.mrf.mxu1 }
 0x2a1   :  { %v556_v57 = vpop.f32.mrf.mxu1 }
 0x2a2   :  { %v1659_v42 = vadd.f32 %v556_v57, %v1596_v12  ;;  %v1676_v57 = vadd.f32 %v1577_v54, %v1596_v12  ;;  %v1696_v54 = vadd.f32 %v1569_v48, %v1596_v12  ;;  %v1716_v48 = vadd.f32 %v1573_v52, %v1596_v12 }
 0x2a3   :  { %v1583_v58 = vpop.f32.mrf.mxu1 }
 0x2a5   :  { %v1585_v59 = vpop.f32.mrf.mxu1 }
 0x2a7   :  { %v564_v60 = vpop.f32.mrf.mxu1 }
 0x2a8   :  { %v1653_v40 = vadd.f32 %v564_v60, %v1594_v11  ;;  %v1669_v60 = vadd.f32 %v554_v56, %v1594_v11 }
 0x2a9   :  { %v566_v61 = vpop.f32.mrf.mxu1 }
 0x2aa   :  { %v1643_v36 = vadd.f32 %v566_v61, %v1596_v12  ;;  %v624_v56 = vmax.f32 %v1669_v60, %v1659_v42 }
 0x2ab   :  { %v570_v62 = vpop.f32.mrf.mxu1 }
 0x2ac   :  { %v630_v61 = vmax.f32 %v1653_v40, %v1643_v36 }
 0x2ad   :  { %v572_v63 = vpop.f32.mrf.mxu1 }
 0x2ae   :  { %v1662_v43 = vadd.f32 %v572_v63, %v1596_v12  ;;  %v1680_v63 = vadd.f32 %v1585_v59, %v1596_v12  ;;  %v1700_v59 = vadd.f32 %v1581_v55, %v1596_v12 }
 0x2af   :  { %v574_v0 = vpop.f32.mrf.mxu1 }
 0x2b0   :  { %v1634_v33 = vadd.f32 %v574_v0, %v1594_v11  ;;  %v1672_v0 = vadd.f32 %v570_v62, %v1594_v11  ;;  %v1688_v62 = vadd.f32 %v1575_v53, %v1594_v11 }
 0x2b1   :  { %v576_v2 = vpop.f32.mrf.mxu1 }
 0x2b2   :  { %v1627_v29 = vadd.f32 %v576_v2, %v1596_v12  ;;  %v633_v1 = vmax.f32 %v1672_v0, %v1662_v43  ;;  %v1692_v2 = vadd.f32 %v1583_v58, %v1594_v11  ;;  %v618_v53 = vmax.f32 %v1688_v62, %v1676_v57 }
 0x2b3   :  { %v580_v3 = vpop.f32.mrf.mxu1  ;;  %v1708_v58 = vadd.f32 %v1567_v47, %v1594_v11  ;;  %v1724_v47 = vadd.f32 %v1571_v49, %v1594_v11 }
 0x2b4   :  { %v636_v39 = vmax.f32 %v1634_v33, %v1627_v29  ;;  %v1656_v41 = vadd.f32 %v580_v3, %v1594_v11  ;;  %v627_v3 = vmax.f32 %v1692_v2, %v1680_v63 }
 0x2b5   :  { %v582_v51 = vpop.f32.mrf.mxu1  ;;  %v615_v52 = vmax.f32 %v1724_v47, %v1716_v48 }
 0x2b6   :  { %v1646_v37 = vadd.f32 %v582_v51, %v1596_v12  ;;  %v1712_v51 = vadd.f32 %v1579_v50, %v1594_v11  ;;  %v1728_v50 = vadd.f32 %v1565_v46, %v1596_v12 }
 0x2b7   :  { %v584_v5 = vpop.f32.mrf.mxu1 }
 0x2b8   :  { %v1618_v25 = vadd.f32 %v584_v5, %v1594_v11  ;;  %v639_v44 = vmax.f32 %v1656_v41, %v1646_v37  ;;  %v621_v55 = vmax.f32 %v1712_v51, %v1700_v59  ;;  %v612_v5 = vmax.f32 %v1708_v58, %v1696_v54 }
 0x2b9   :  { %v586_v9 = vpop.f32.mrf.mxu1  ;;  %v609_v7 = vmax.f32 %v1734_v6, %v1728_v50 }
 0x2ba   :  { %v1613_v22 = vadd.f32 %v586_v9, %v1596_v12 }
 0x2bb   :  { %v590_v10 = vpop.f32.mrf.mxu1 }
 0x2bc   :  { %v1599_v14 = vadd.f32 %v590_v10, %v1594_v11  ;;  %v642_v31 = vmax.f32 %v1618_v25, %v1613_v22 }
 0x2bd   :  { %v592_v13 = vpop.f32.mrf.mxu1 }
 0x2be   :  { %v1602_v15 = vadd.f32 %v592_v13, %v1596_v12 }
 0x2bf   :  { %v594_v16 = vpop.f32.mrf.mxu1 }
 0x2c0   :  { %v645_v17 = vmax.f32 %v1599_v14, %v1602_v15  ;;  %v1607_v19 = vadd.f32 %v594_v16, %v1594_v11 }
 0x2c1   :  { %v596_v18 = vpop.f32.mrf.mxu1 }
 0x2c2   :  { %v1610_v20 = vadd.f32 %v596_v18, %v1596_v12  ;;  %646 = vmax.xlane.f32.xlu1 %v645_v17 }
 0x2c3   :  { %v600_v21 = vpop.f32.mrf.mxu1 }
 0x2c4   :  { %v648_v23 = vmax.f32 %v1607_v19, %v1610_v20  ;;  %v1621_v26 = vadd.f32 %v600_v21, %v1594_v11 }
 0x2c5   :  { %v602_v24 = vpop.f32.mrf.mxu1 }
 0x2c6   :  { %v1624_v27 = vadd.f32 %v602_v24, %v1596_v12  ;;  %649 = vmax.xlane.f32.xlu1 %v648_v23 }
 0x2c7   :  { %v604_v28 = vpop.f32.mrf.mxu1 }
 0x2c8   :  { %v651_v30 = vmax.f32 %v1621_v26, %v1624_v27  ;;  %v1637_v34 = vadd.f32 %v604_v28, %v1594_v11 }
 0x2c9   :  { %v606_v32 = vpop.f32.mrf.mxu1 }
 0x2ca   :  { %v1640_v35 = vadd.f32 %v606_v32, %v1596_v12  ;;  %652 = vmax.xlane.f32.xlu0 %v651_v30  ;;  %643 = vmax.xlane.f32.xlu1 %v642_v31 }
 0x2cc   :  { %v654_v38 = vmax.f32 %v1637_v34, %v1640_v35 }
 0x2ce   :  { %655 = vmax.xlane.f32.xlu0 %v654_v38  ;;  %637 = vmax.xlane.f32.xlu1 %v636_v39 }
 0x2d2   :  { %640 = vmax.xlane.f32.xlu0 %v639_v44  ;;  %631 = vmax.xlane.f32.xlu1 %v630_v61 }
 0x2d6   :  { %634 = vmax.xlane.f32.xlu0 %v633_v1  ;;  %625 = vmax.xlane.f32.xlu1 %v624_v56 }
 0x2da   :  { %628 = vmax.xlane.f32.xlu0 %v627_v3  ;;  %619 = vmax.xlane.f32.xlu1 %v618_v53 }
 0x2de   :  { %622 = vmax.xlane.f32.xlu0 %v621_v55  ;;  %613 = vmax.xlane.f32.xlu1 %v612_v5 }
 0x2e2   :  { %616 = vmax.xlane.f32.xlu0 %v615_v52 }
 0x2e6   :  { %610 = vmax.xlane.f32.xlu0 %v609_v7 }
 0x34b   :  { %v647_v49 = vpop.xlane.xlu1 %646 }
 0x34c   :  { %v681_v8 = vsub.f32 %v1599_v14, %v647_v49  ;;  %v682_v9 = vsub.f32 %v1602_v15, %v647_v49 }
 0x34e   :  { %v737_v46 = vmul.f32 1.442695, %v681_v8  ;;  %v739_v13 = vmul.f32 1.442695, %v682_v9 }
 0x34f   :  { %v650_v10 = vpop.xlane.xlu1 %649 }
 0x350   :  { %v683_v12 = vsub.f32 %v1607_v19, %v650_v10  ;;  %v684_v16 = vsub.f32 %v1610_v20, %v650_v10  ;;  %1241 = vpow2.f32 %v737_v46 }
 0x351   :  { %1243 = vpow2.f32 %v739_v13 }
 0x352   :  { %v741_v21 = vmul.f32 1.442695, %v683_v12  ;;  %v743_v15 = vmul.f32 1.442695, %v684_v16 }
 0x353   :  { %v653_v17 = vpop.xlane.xlu0 %652  ;;  %v644_v45 = vpop.xlane.xlu1 %643 }
 0x354   :  { %v685_v11 = vsub.f32 %v1621_v26, %v653_v17  ;;  %v686_v18 = vsub.f32 %v1624_v27, %v653_v17  ;;  %v679_v14 = vsub.f32 %v1618_v25, %v644_v45  ;;  %v680_v28 = vsub.f32 %v1613_v22, %v644_v45 }
 0x356   :  { %v745_v23 = vmul.f32 1.442695, %v685_v11  ;;  %v747_v24 = vmul.f32 1.442695, %v686_v18  ;;  %v733_v26 = vmul.f32 1.442695, %v679_v14 }
 0x357   :  { %v656_v19 = vpop.xlane.xlu0 %655  ;;  %v638_v30 = vpop.xlane.xlu1 %637  ;;  %v735_v38 = vmul.f32 1.442695, %v680_v28 }
 0x358   :  { %1245 = vpow2.f32 %v745_v23  ;;  %v687_v20 = vsub.f32 %v1637_v34, %v656_v19  ;;  %v688_v31 = vsub.f32 %v1640_v35, %v656_v19  ;;  %v675_v25 = vsub.f32 %v1634_v33, %v638_v30 }
 0x359   :  { %1247 = vpow2.f32 %v747_v24  ;;  %v676_v34 = vsub.f32 %v1627_v29, %v638_v30 }
 0x35a   :  { %1249 = vpow2.f32 %v741_v21  ;;  %v749_v27 = vmul.f32 1.442695, %v687_v20  ;;  %v751_v32 = vmul.f32 1.442695, %v688_v31  ;;  %v725_v56 = vmul.f32 1.442695, %v675_v25 }
 0x35b   :  { %1251 = vpow2.f32 %v743_v15  ;;  %v641_v39 = vpop.xlane.xlu0 %640  ;;  %v632_v44 = vpop.xlane.xlu1 %631 }
 0x35c   :  { %1253 = vpow2.f32 %v749_v27  ;;  %v677_v22 = vsub.f32 %v1656_v41, %v641_v39  ;;  %v678_v61 = vsub.f32 %v1646_v37, %v641_v39  ;;  %v671_v3 = vsub.f32 %v1653_v40, %v632_v44 }
 0x35d   :  { %1255 = vpow2.f32 %v751_v32  ;;  %v1755_v41 = vpop.eup %1241  ;;  %v727_v37 = vmul.f32 1.442695, %v676_v34  ;;  %v672_v52 = vsub.f32 %v1643_v36, %v632_v44 }
 0x35e   :  { %1257 = vpow2.f32 %v733_v26  ;;  %v729_v35 = vmul.f32 1.442695, %v677_v22  ;;  %v731_v1 = vmul.f32 1.442695, %v678_v61  ;;  %v717_v49 = vmul.f32 1.442695, %v671_v3  ;;  %v1759_v9 = vpop.eup %1243 }
 0x35f   :  { %1259 = vpow2.f32 %v735_v38  ;;  %v635_v53 = vpop.xlane.xlu0 %634  ;;  %v626_v55 = vpop.xlane.xlu1 %625  ;;  %v719_v36 = vmul.f32 1.442695, %v672_v52  ;;  %v789_v24 = vadd.f32 %v1759_v9, %v1755_v41 }
 0x360   :  { %1261 = vpow2.f32 %v729_v35  ;;  %v673_v33 = vsub.f32 %v1672_v0, %v635_v53  ;;  %v674_v5 = vsub.f32 %v1662_v43, %v635_v53  ;;  %v667_v8 = vsub.f32 %v1669_v60, %v626_v55 }
 0x361   :  { %1263 = vpow2.f32 %v731_v1  ;;  %v668_v60 = vsub.f32 %v1659_v42, %v626_v55 }
 0x362   :  { %v721_v29 = vmul.f32 1.442695, %v673_v33  ;;  %v723_v7 = vmul.f32 1.442695, %v674_v5  ;;  %1265 = vpow2.f32 %v725_v56  ;;  %v709_v45 = vmul.f32 1.442695, %v667_v8 }
 0x363   :  { %v629_v40 = vpop.xlane.xlu0 %628  ;;  %v620_v46 = vpop.xlane.xlu1 %619 }
 0x364   :  { %1267 = vpow2.f32 %v721_v29  ;;  %v669_v0 = vsub.f32 %v1692_v2, %v629_v40  ;;  %v670_v43 = vsub.f32 %v1680_v63, %v629_v40  ;;  %v663_v14 = vsub.f32 %v1688_v62, %v620_v46 }
 0x365   :  { %v1763_v10 = vpop.eup %1245  ;;  %1269 = vpow2.f32 %v723_v7 }
 0x366   :  { %v1765_v12 = vpop.eup %1247  ;;  %1271 = vpow2.f32 %v727_v37  ;;  %v713_v13 = vmul.f32 1.442695, %v669_v0  ;;  %v715_v16 = vmul.f32 1.442695, %v670_v43  ;;  %v701_v25 = vmul.f32 1.442695, %v663_v14 }
 0x367   :  { %v1767_v17 = vpop.eup %1249  ;;  %1273 = vpow2.f32 %v717_v49  ;;  %v623_v11 = vpop.xlane.xlu0 %622  ;;  %v795_v63 = vadd.f32 %v1765_v12, %v1763_v10 }
 0x368   :  { %v1772_v2 = vpop.eup %1251  ;;  %1275 = vpow2.f32 %v713_v13  ;;  %v665_v18 = vsub.f32 %v1712_v51, %v623_v11  ;;  %v666_v21 = vsub.f32 %v1700_v59, %v623_v11  ;;  %v711_v51 = vmul.f32 1.442695, %v668_v60  ;;  %v614_v30 = vpop.xlane.xlu1 %613 }
 0x369   :  { %v1776_v23 = vpop.eup %1253  ;;  %1277 = vpow2.f32 %v715_v16  ;;  %796 = vadd.xlane.f32.xlu0 %v795_v63  ;;  %v664_v59 = vsub.f32 %v1676_v57, %v620_v46  ;;  %v792_v57 = vadd.f32 %v1772_v2, %v1767_v17  ;;  %v659_v39 = vsub.f32 %v1708_v58, %v614_v30 }
 0x36a   :  { %v1780_v42 = vpop.eup %1255  ;;  %1279 = vpow2.f32 %v719_v36  ;;  %v705_v15 = vmul.f32 1.442695, %v665_v18  ;;  %v707_v28 = vmul.f32 1.442695, %v666_v21 }
 0x36b   :  { %v1783_v19 = vpop.eup %1257  ;;  %1281 = vpow2.f32 %v709_v45  ;;  %v617_v20 = vpop.xlane.xlu0 %616  ;;  %v798_v31 = vadd.f32 %v1780_v42, %v1776_v23  ;;  %v703_v61 = vmul.f32 1.442695, %v664_v59 }
 0x36c   :  { %v1788_v26 = vpop.eup %1259  ;;  %1283 = vpow2.f32 %v705_v15  ;;  %v661_v27 = vsub.f32 %v1724_v47, %v617_v20  ;;  %v662_v62 = vsub.f32 %v1716_v48, %v617_v20  ;;  %v660_v47 = vsub.f32 %v1696_v54, %v614_v30 }
 0x36d   :  { %v1792_v32 = vpop.eup %1261  ;;  %1285 = vpow2.f32 %v707_v28  ;;  %799 = vadd.xlane.f32.xlu1 %v798_v31  ;;  %790 = vadd.xlane.f32.xlu0 %v789_v24  ;;  %v693_v54 = vmul.f32 1.442695, %v659_v39 }
 0x36e   :  { %v1796_v38 = vpop.eup %1263  ;;  %v697_v44 = vmul.f32 1.442695, %v661_v27  ;;  %v699_v22 = vmul.f32 1.442695, %v662_v62  ;;  %1287 = vpow2.f32 %v711_v51  ;;  %v695_v5 = vmul.f32 1.442695, %v660_v47 }
 0x36f   :  { %v611_v48 = vpop.xlane.xlu0 %610  ;;  %v783_v34 = vadd.f32 %v1796_v38, %v1792_v32  ;;  %v1802_v35 = vpop.eup %1265 }
 0x370   :  { %1289 = vpow2.f32 %v697_v44  ;;  %v657_v1 = vsub.f32 %v1734_v6, %v611_v48  ;;  %v658_v56 = vsub.f32 %v1728_v50, %v611_v48  ;;  %v786_v50 = vadd.f32 %v1788_v26, %v1783_v19 }
 0x371   :  { %v1806_v3 = vpop.eup %1267  ;;  %1291 = vpow2.f32 %v699_v22  ;;  %784 = vadd.xlane.f32.xlu0 %v783_v34  ;;  %793 = vadd.xlane.f32.xlu1 %v792_v57 }
 0x372   :  { %v1808_v58 = vpop.eup %1269  ;;  %1293 = vpow2.f32 %v701_v25  ;;  %v689_v53 = vmul.f32 1.442695, %v657_v1  ;;  %v691_v55 = vmul.f32 1.442695, %v658_v56 }
 0x373   :  { %v1810_v33 = vpop.eup %1271  ;;  %1295 = vpow2.f32 %v703_v61  ;;  %v777_v6 = vadd.f32 %v1808_v58, %v1806_v3 }
 0x374   :  { %v1816_v37 = vpop.eup %1273  ;;  %1297 = vpow2.f32 %v689_v53  ;;  %v780_v8 = vadd.f32 %v1810_v33, %v1802_v35 }
 0x375   :  { %v1818_v52 = vpop.eup %1275  ;;  %1299 = vpow2.f32 %v691_v55  ;;  %778 = vadd.xlane.f32.xlu0 %v777_v6  ;;  %787 = vadd.xlane.f32.xlu1 %v786_v50 }
 0x376   :  { %v1820_v29 = vpop.eup %1277  ;;  %1301 = vpow2.f32 %v693_v54 }
 0x377   :  { %v1822_v7 = vpop.eup %1279  ;;  %1303 = vpow2.f32 %v695_v5  ;;  %v771_v49 = vadd.f32 %v1820_v29, %v1818_v52 }
 0x378   :  { %v1828_v40 = vpop.eup %1281  ;;  %v774_v36 = vadd.f32 %v1822_v7, %v1816_v37 }
 0x379   :  { %v1830_v0 = vpop.eup %1283  ;;  %772 = vadd.xlane.f32.xlu0 %v771_v49  ;;  %781 = vadd.xlane.f32.xlu1 %v780_v8 }
 0x37a   :  { %v1832_v43 = vpop.eup %1285 }
 0x37b   :  { %v765_v46 = vadd.f32 %v1832_v43, %v1830_v0  ;;  %v1838_v13 = vpop.eup %1287 }
 0x37c   :  { %v768_v63 = vadd.f32 %v1838_v13, %v1828_v40 }
 0x37d   :  { %v1840_v16 = vpop.eup %1289  ;;  %766 = vadd.xlane.f32.xlu0 %v765_v46  ;;  %775 = vadd.xlane.f32.xlu1 %v774_v36 }
 0x37e   :  { %v1842_v60 = vpop.eup %1291 }
 0x37f   :  { %v1844_v45 = vpop.eup %1293  ;;  %v759_v11 = vadd.f32 %v1842_v60, %v1840_v16 }
 0x380   :  { %v1850_v18 = vpop.eup %1295 }
 0x381   :  { %v1852_v21 = vpop.eup %1297  ;;  %760 = vadd.xlane.f32.xlu0 %v759_v11  ;;  %769 = vadd.xlane.f32.xlu1 %v768_v63  ;;  %v762_v28 = vadd.f32 %v1850_v18, %v1844_v45 }
 0x382   :  { %v1854_v24 = vpop.eup %1299 }
 0x383   :  { %v1856_v14 = vpop.eup %1301  ;;  %v753_v15 = vadd.f32 %v1854_v24, %v1852_v21 }
 0x384   :  { %v1862_v51 = vpop.eup %1303 }
 0x385   :  { %754 = vadd.xlane.f32.xlu0 %v753_v15  ;;  %763 = vadd.xlane.f32.xlu1 %v762_v28  ;;  %v756_v59 = vadd.f32 %v1862_v51, %v1856_v14 }
 0x389   :  { %757 = vadd.xlane.f32.xlu1 %v756_v59 }
 0x3f2   :  { %v797_v30 = vpop.xlane.xlu0 %796 }
 0x3f3   :  { %1305 = vrcp.f32 %v797_v30 }
 0x3f6   :  { %v791_v20 = vpop.xlane.xlu0 %790  ;;  %v800_v31 = vpop.xlane.xlu1 %799 }
 0x3f7   :  { %1307 = vrcp.f32 %v791_v20 }
 0x3f8   :  { %1309 = vrcp.f32 %v800_v31 }
 0x3fa   :  { %v785_v27 = vpop.xlane.xlu0 %784  ;;  %v794_v62 = vpop.xlane.xlu1 %793 }
 0x3fb   :  { %1311 = vrcp.f32 %v785_v27 }
 0x3fc   :  { %1313 = vrcp.f32 %v794_v62 }
 0x3fe   :  { %v779_v57 = vpop.xlane.xlu0 %778  ;;  %v788_v25 = vpop.xlane.xlu1 %787 }
 0x3ff   :  { %1315 = vrcp.f32 %v779_v57 }
 0x400   :  { %v1306_v39 = vpop.eup %1305  ;;  %1317 = vrcp.f32 %v788_v25 }
 0x401   :  { %v831_v44 = vmul.f32 %v1306_v39, %v797_v30 }
 0x402   :  { %v773_v22 = vpop.xlane.xlu0 %772  ;;  %v782_v61 = vpop.xlane.xlu1 %781 }
 0x403   :  { %v847_v47 = vsub.f32 2.0, %v831_v44  ;;  %1319 = vrcp.f32 %v773_v22 }
 0x404   :  { %v1308_v48 = vpop.eup %1307  ;;  %1321 = vrcp.f32 %v782_v61 }
 0x405   :  { %v1310_v34 = vpop.eup %1309  ;;  %v829_v1 = vmul.f32 %v1308_v48, %v791_v20  ;;  %v863_v55 = vmul.f32 %v1306_v39, %v847_v47 }
 0x406   :  { %v832_v56 = vmul.f32 %v1310_v34, %v800_v31  ;;  %v767_v54 = vpop.xlane.xlu0 %766  ;;  %v1866_v53 = vpop.xlane.xlu1 %775 }
 0x407   :  { %v845_v5 = vsub.f32 2.0, %v829_v1  ;;  %1323 = vrcp.f32 %v767_v54  ;;  %v893_v28 = vmul.f32 %v1763_v10, %v863_v55  ;;  %v894_v30 = vmul.f32 %v1765_v12, %v863_v55 }
 0x408   :  { %v1312_v6 = vpop.eup %1311  ;;  %v848_v50 = vsub.f32 2.0, %v832_v56  ;;  %1325 = vrcp.f32 %v1866_v53 }
 0x409   :  { %v1314_v49 = vpop.eup %1313  ;;  %v861_v8 = vmul.f32 %v1308_v48, %v845_v5  ;;  %v827_v46 = vmul.f32 %v1312_v6, %v785_v27 }
 0x40a   :  { %v864_v36 = vmul.f32 %v1310_v34, %v848_v50  ;;  %v830_v11 = vmul.f32 %v1314_v49, %v794_v62  ;;  %v1869_v63 = vpop.xlane.xlu0 %760  ;;  %v1871_v15 = vpop.xlane.xlu1 %769 }
 0x40b   :  { %v843_v59 = vsub.f32 2.0, %v827_v46  ;;  %1327 = vrcp.f32 %v1869_v63  ;;  %v889_v44 = vmul.f32 %v1755_v41, %v861_v8 }
 0x40c   :  { %v1316_v20 = vpop.eup %1315  ;;  %v895_v31 = vmul.f32 %v1776_v23, %v864_v36  ;;  %v846_v39 = vsub.f32 2.0, %v830_v11  ;;  %1329 = vrcp.f32 %v1871_v15  ;;  %v896_v27 = vmul.f32 %v1780_v42, %v864_v36 }
 0x40d   :  { %v1318_v62 = vpop.eup %1317  ;;  %v825_v47 = vmul.f32 %v1316_v20, %v779_v57  ;;  %v859_v55 = vmul.f32 %v1312_v6, %v843_v59  ;;  %v890_v23 = vmul.f32 %v1759_v9, %v861_v8 }
 0x40e   :  { %v862_v48 = vmul.f32 %v1314_v49, %v846_v39  ;;  %v828_v34 = vmul.f32 %v1318_v62, %v788_v25  ;;  %v1880_v10 = vpop.xlane.xlu0 %754  ;;  %v1882_v1 = vpop.xlane.xlu1 %763  ;;  %v987_v56 = vpack.c.bf16 %v896_v27, %v894_v30  ;;  %v986_v12 = vpack.c.bf16 %v895_v31, %v893_v28 }
 0x40f   :  { %v841_v5 = vsub.f32 2.0, %v825_v47  ;;  %1331 = vrcp.f32 %v1880_v10  ;;  %v885_v59 = vmul.f32 %v1792_v32, %v859_v55 }
 0x410   :  { %v1320_v50 = vpop.eup %1319  ;;  %v891_v42 = vmul.f32 %v1767_v17, %v862_v48  ;;  %v844_v46 = vsub.f32 2.0, %v828_v34  ;;  %1333 = vrcp.f32 %v1882_v1  ;;  %988 = vmatprep.subr.bf16.mxu0 %v987_v56  ;;  %v892_v41 = vmul.f32 %v1772_v2, %v862_v48 }
 0x411   :  { %v1322_v57 = vpop.eup %1321  ;;  %v823_v25 = vmul.f32 %v1320_v50, %v773_v22  ;;  %989 = vmatpush1.bf16.msra.mxu0 %v986_v12  ;;  %v857_v9 = vmul.f32 %v1316_v20, %v841_v5  ;;  %v886_v2 = vmul.f32 %v1796_v38, %v859_v55 }
 0x412   :  { %v860_v49 = vmul.f32 %v1318_v62, %v844_v46  ;;  %v826_v36 = vmul.f32 %v1322_v57, %v782_v61  ;;  %v758_v6 = vpop.xlane.xlu1 %757  ;;  %v985_v11 = vpack.c.bf16 %v892_v41, %v890_v23  ;;  %v984_v28 = vpack.c.bf16 %v891_v42, %v889_v44 }
 0x413   :  { %v839_v8 = vsub.f32 2.0, %v823_v25  ;;  %1335 = vrcp.f32 %v758_v6  ;;  %v881_v20 = vmul.f32 %v1806_v3, %v857_v9  ;;  %v882_v38 = vmul.f32 %v1808_v58, %v857_v9 }
 0x414   :  { %v1324_v17 = vpop.eup %1323  ;;  %v887_v30 = vmul.f32 %v1783_v19, %v860_v49  ;;  %v842_v31 = vsub.f32 2.0, %v826_v36  ;;  %990 = vmatprep.subr.bf16.mxu0 %v985_v11  ;;  %v888_v22 = vmul.f32 %v1788_v26, %v860_v49 }
 0x415   :  { %v1326_v39 = vpop.eup %1325  ;;  %v821_v27 = vmul.f32 %v1324_v17, %v767_v54  ;;  %991 = vmatpush1.bf16.msra.mxu0 %v984_v28  ;;  %v855_v47 = vmul.f32 %v1320_v50, %v839_v8 }
 0x416   :  { %v858_v61 = vmul.f32 %v1322_v57, %v842_v31  ;;  %v824_v62 = vmul.f32 %v1326_v39, %v1866_v53  ;;  %v983_v44 = vpack.c.bf16 %v888_v22, %v886_v2  ;;  %v982_v32 = vpack.c.bf16 %v887_v30, %v885_v59 }
 0x417   :  { %v837_v48 = vsub.f32 2.0, %v821_v27  ;;  %v877_v23 = vmul.f32 %v1818_v52, %v855_v47 }
 0x418   :  { %v1328_v34 = vpop.eup %1327  ;;  %v883_v19 = vmul.f32 %v1802_v35, %v858_v61  ;;  %v840_v56 = vsub.f32 2.0, %v824_v62  ;;  %992 = vmatprep.subr.bf16.mxu0 %v983_v44  ;;  %v884_v26 = vmul.f32 %v1810_v33, %v858_v61  ;;  %v878_v35 = vmul.f32 %v1820_v29, %v855_v47 }
 0x419   :  { %v1330_v54 = vpop.eup %1329  ;;  %v819_v12 = vmul.f32 %v1328_v34, %v1869_v63  ;;  %993 = vmatpush1.bf16.msra.mxu0 %v982_v32  ;;  %v853_v50 = vmul.f32 %v1324_v17, %v837_v48 }
 0x41a   :  { %v856_v53 = vmul.f32 %v1326_v39, %v840_v56  ;;  %v822_v55 = vmul.f32 %v1330_v54, %v1871_v15  ;;  %v981_v5 = vpack.c.bf16 %v884_v26, %v882_v38  ;;  %v980_v3 = vpack.c.bf16 %v883_v19, %v881_v20 }
 0x41b   :  { %v835_v58 = vsub.f32 2.0, %v819_v12  ;;  %v873_v36 = vmul.f32 %v1830_v0, %v853_v50  ;;  %v874_v11 = vmul.f32 %v1832_v43, %v853_v50 }
 0x41c   :  { %v1332_v42 = vpop.eup %1331  ;;  %v879_v46 = vmul.f32 %v1816_v37, %v856_v53  ;;  %v838_v41 = vsub.f32 2.0, %v822_v55  ;;  %994 = vmatprep.subr.bf16.mxu0 %v981_v5  ;;  %v880_v33 = vmul.f32 %v1822_v7, %v856_v53 }
 0x41d   :  { %v1334_v63 = vpop.eup %1333  ;;  %v817_v57 = vmul.f32 %v1332_v42, %v1880_v10  ;;  %995 = vmatpush1.bf16.msra.mxu0 %v980_v3  ;;  %v851_v28 = vmul.f32 %v1328_v34, %v835_v58 }
 0x41e   :  { %v854_v15 = vmul.f32 %v1330_v54, %v838_v41  ;;  %v820_v25 = vmul.f32 %v1334_v63, %v1882_v1  ;;  %v979_v49 = vpack.c.bf16 %v880_v33, %v878_v35  ;;  %v978_v52 = vpack.c.bf16 %v879_v46, %v877_v23 }
 0x41f   :  { %v833_v29 = vsub.f32 2.0, %v817_v57  ;;  %v869_v0 = vmul.f32 %v1840_v16, %v851_v28  ;;  %v870_v43 = vmul.f32 %v1842_v60, %v851_v28  ;;  %v971_v60 = vld [vmem:[%s1941_s6] sm:$0x1] }
 0x420   :  { %v1336_v37 = vpop.eup %1335  ;;  %v875_v59 = vmul.f32 %v1828_v40, %v854_v15  ;;  %v836_v9 = vsub.f32 2.0, %v820_v25  ;;  %996 = vmatprep.subr.bf16.mxu0 %v979_v49  ;;  %v876_v7 = vmul.f32 %v1838_v13, %v854_v15 }
 0x421   :  { %v818_v10 = vmul.f32 %v1336_v37, %v758_v6  ;;  %997 = vmatpush1.bf16.msra.mxu0 %v978_v52  ;;  %v849_v30 = vmul.f32 %v1332_v42, %v833_v29 }
 0x422   :  { %v852_v8 = vmul.f32 %v1334_v63, %v836_v9  ;;  %v977_v17 = vpack.c.bf16 %v876_v7, %v874_v11  ;;  %v976_v1 = vpack.c.bf16 %v875_v59, %v873_v36 }
 0x423   :  { %v834_v31 = vsub.f32 2.0, %v818_v10  ;;  %v865_v6 = vmul.f32 %v1852_v21, %v849_v30  ;;  %v866_v27 = vmul.f32 %v1854_v24, %v849_v30  ;;  %v1338_v21 = vmov 1983009808  }
 0x424   :  { %v871_v2 = vmul.f32 %v1844_v45, %v852_v8  ;;  %998 = vmatprep.subr.bf16.mxu0 %v977_v17  ;;  %v872_v40 = vmul.f32 %v1850_v18, %v852_v8  ;;  %v36_v18 = vld [vmem:[%s1942_s7] sm:$0xf]  ;;  %v1033_v24 = vunpack.c.l.s4 %v1338_v21 }
 0x425   :  { %v850_v22 = vmul.f32 %v1336_v37, %v834_v31  ;;  %999 = vmatpush1.bf16.msra.mxu0 %v976_v1  ;;  %37 = vst [vmem:[%s1943_s9] sm:$0xf] %v36_v18 }
 0x426   :  { %v975_v39 = vpack.c.bf16 %v872_v40, %v870_v43  ;;  %v974_v13 = vpack.c.bf16 %v871_v2, %v869_v0 }
 0x427   :  { %v867_v61 = vmul.f32 %v1856_v14, %v850_v22  ;;  %v868_v62 = vmul.f32 %v1862_v51, %v850_v22  ;;  %v1034_v14 = vunpack.c.0.s8 %v1033_v24 }
 0x428   :  { %1000 = vmatprep.subr.bf16.mxu0 %v975_v39 }
 0x429   :  { %v972_v16 = vpack.c.bf16 %v867_v61, %v865_v6  ;;  %1001 = vmatpush1.bf16.msra.mxu0 %v974_v13  ;;  %v973_v45 = vpack.c.bf16 %v868_v62, %v866_v27  ;;  %v1037_v44 = vsub.s32 %v1034_v14, %v1587_v4 }
 0x42b   :  { %1002 = vmatprep.subr.bf16.mxu0 %v973_v45 }
 0x42c   :  { %v970_v47 = vld [vmem:[%s1943_s9] sm:$0xf] }
 0x42d   :  { %1003 = vmatpush1.bf16.msra.mxu0 %v972_v16 }
 0x430   :  { %1021 = vmatmul.mubr.bf16.vlgmr.msra.gmra.mxu0 %v971_v60 }
 0x4f0   :  { %v1022_v51 = vpop.f32.mrf.mxu0 }
 0x4f2   :  { %v1024_v32 = vpop.f32.mrf.mxu0 }
 0x4f3   :  { %v1031_v20 = vcombine.low %v1022_v51, %v1024_v32 }
 0x4f4   :  { %v1026_v48 = vpop.f32.mrf.mxu0 }
 0x4f5   :  { %v1038_v34 = vrot.slane %v1031_v20, %v1037_v44 }
 0x4f6   :  { %v1027_v19 = vpop.f32.mrf.mxu0 }
 0x4f7   :  { %v1040_v56 = vadd.f32 %v1038_v34, %v970_v47 }
 0x4f9   :  { %1041 = vst [vmem:[%s1943_s9] sm:$0xf] %v1040_v56 }

</bundles_post_ra>
